<compile_context>
chip_gen: v7x
topology: tpu7x:2x2x1
jax: 0.10.0
libtpu: 0.0.40
codegen_flags: <defaults>
</compile_context>

<pallas_src>
import functools

import jax
import jax.numpy as jnp
from jax.experimental import pallas as pl
from jax.experimental.pallas import tpu as pltpu


# --------------------------------------------------------------------------- #
# Pallas kernel: fused 1x1-conv (matmul) + combined bilinear upsample matmul.
# --------------------------------------------------------------------------- #
def _segmenter_kernel(x_ref, w_ref, b_ref, rt_ref, o_ref):
    # x_ref : (1, Cin, H*W)        bf16  -- one batch element, NCHW-native view
    # w_ref : (nCls, Cin)          bf16  -- conv weight (1x1 kernel squeezed)
    # b_ref : (nCls, 1)            f32   -- conv bias (broadcast over pixels)
    # rt_ref: (H*W, Hout*Wout)     f32   -- kron(Rh, Rw)^T combined interpolation
    # o_ref : (1, nCls, Hout*Wout) f32
    x = x_ref[0]                                                    # (Cin, H*W)

    # 1x1 convolution == channel matmul on the MXU (bf16 operands, f32 acc).
    y = jnp.dot(w_ref[...], x, preferred_element_type=jnp.float32)  # (nCls, H*W)
    y = y + b_ref[...]                                               # bias (free VPU filler)

    # Bilinear upsample (align_corners=True) as a single right-multiply by
    # kron(Rh, Rw)^T.  Output last dim is a multiple of 128 -> lane-dense stores.
    out = jnp.dot(y, rt_ref[...], preferred_element_type=jnp.float32)  # (nCls, Hout*Wout)

    o_ref[0] = out


def _interp_matrix(out_size: int, in_size: int) -> jnp.ndarray:
    """Bilinear interpolation matrix, align_corners=True (== F.upsample_bilinear)."""
    p = jnp.arange(out_size, dtype=jnp.float32)
    if out_size > 1:
        src = p * (in_size - 1) / (out_size - 1)
    else:
        src = jnp.zeros((out_size,), dtype=jnp.float32)
    i0 = jnp.floor(src).astype(jnp.int32)
    i0 = jnp.clip(i0, 0, in_size - 1)
    i1 = jnp.minimum(i0 + 1, in_size - 1)
    frac = src - i0.astype(jnp.float32)
    rows = jnp.arange(out_size)
    m = jnp.zeros((out_size, in_size), dtype=jnp.float32)
    m = m.at[rows, i0].add(1.0 - frac)
    m = m.at[rows, i1].add(frac)
    return m


@functools.partial(jax.jit, static_argnames=("orig_size",))
def alexnet_segmenter_forward(x_nchw, weight, bias, orig_size):
    """x_nchw: (N, Cin, H, W) f32; weight: (nCls, Cin, 1, 1); bias: (nCls,)."""
    if isinstance(orig_size, int):
        orig_size = (orig_size, orig_size)
    Hout, Wout = orig_size

    N, Cin, H, W = x_nchw.shape
    nCls = weight.shape[0]
    HW = H * W
    HWout = Hout * Wout

    # NCHW-native view: free reshape (no transpose, no extra HBM round trip).
    # bf16 cast halves the dominant x DMA and uses the native bf16 MXU path.
    x3 = x_nchw.reshape(N, Cin, HW).astype(jnp.bfloat16)
    w2d = weight.reshape(nCls, Cin).astype(jnp.bfloat16)             # (nCls, Cin)
    b = bias.reshape(nCls, 1).astype(jnp.float32)                    # (nCls, 1)

    # Combined bilinear interpolation matrix R = kron(Rh, Rw); kernel uses R^T.
    rh = _interp_matrix(Hout, H)                                     # (Hout, H)
    rw = _interp_matrix(Wout, W)                                     # (Wout, W)
    rt = jnp.kron(rh.T, rw.T).astype(jnp.float32)                    # (H*W, Hout*Wout)

    out_flat = pl.pallas_call(
        _segmenter_kernel,
        out_shape=jax.ShapeDtypeStruct((N, nCls, HWout), jnp.float32),
        grid_spec=pltpu.PrefetchScalarGridSpec(
            num_scalar_prefetch=0,
            grid=(N,),
            in_specs=[
                pl.BlockSpec((1, Cin, HW), lambda n: (n, 0, 0)),
                pl.BlockSpec((nCls, Cin), lambda n: (0, 0)),
                pl.BlockSpec((nCls, 1), lambda n: (0, 0)),
                pl.BlockSpec((HW, HWout), lambda n: (0, 0)),
            ],
            out_specs=pl.BlockSpec((1, nCls, HWout), lambda n: (n, 0, 0)),
        ),
        compiler_params=pltpu.CompilerParams(
            dimension_semantics=("parallel",),   # batch across TCs on v7x megacore
        ),
    )(x3, w2d, b, rt)

    # Free reshape back to PyTorch NCHW convention: (N, nCls, Hout, Wout).
    return out_flat.reshape(N, nCls, Hout, Wout)


def _reference_forward(x_nchw, weight, bias, orig_size, *, bf16_inputs):
    """Pure-JAX reference with identical semantics (for verification)."""
    if isinstance(orig_size, int):
        orig_size = (orig_size, orig_size)
    Hout, Wout = orig_size
    N, Cin, H, W = x_nchw.shape
    nCls = weight.shape[0]
    w2d = weight.reshape(nCls, Cin)
    xr = x_nchw
    if bf16_inputs:   # match the kernel's bf16-operand / f32-accumulate path
        w2d = w2d.astype(jnp.bfloat16).astype(jnp.float32)
        xr = xr.astype(jnp.bfloat16).astype(jnp.float32)
    y = jnp.einsum("nchw,kc->nkhw", xr, w2d) + bias[None, :, None, None]
    rh = _interp_matrix(Hout, H)
    rw = _interp_matrix(Wout, W)
    return jnp.einsum("ph,qw,nkhw->nkpq", rh, rw, y)


if __name__ == "__main__":
    # Small but module-consistent shapes: Cin must be 4096 (conv in_channels).
    N, Cin, H, W = 2, 4096, 6, 6
    nCls = 21
    orig_size = 32

    key = jax.random.PRNGKey(0)
    kx, kw, kb = jax.random.split(key, 3)
    x = jax.random.normal(kx, (N, Cin, H, W), dtype=jnp.float32)
    # Deterministic synthetic parameters (Conv2d(4096, nCls, 1) shapes).
    weight = jax.random.normal(kw, (nCls, Cin, 1, 1), dtype=jnp.float32) * 0.02
    bias = jax.random.normal(kb, (nCls,), dtype=jnp.float32) * 0.1

    out = alexnet_segmenter_forward(x, weight, bias, orig_size)
    out = jax.block_until_ready(out)

    assert out.shape == (N, nCls, orig_size, orig_size), out.shape

    # Tight check vs a reference following the same bf16-operand math.
    ref_bf16 = _reference_forward(x, weight, bias, orig_size, bf16_inputs=True)
    assert jnp.allclose(out, ref_bf16, atol=1e-3, rtol=1e-3), "mismatch vs bf16 reference"

    # Loose sanity check vs the full-f32 reference (bf16 quantization noise only).
    ref_f32 = _reference_forward(x, weight, bias, orig_size, bf16_inputs=False)
    assert jnp.allclose(out, ref_f32, atol=5e-2, rtol=5e-2), "mismatch vs f32 reference"

    print("KERNEL_OK")
</pallas_src>

<mosaic_0001>
module attributes {stable_mosaic.version = 11 : i64} {
  func.func private @main(%arg0: i32) attributes {dimension_semantics = [#tpu.dimension_semantics<core_parallel>], iteration_bounds = array<i64: 2>, tpu.core_type = #tpu.core_type<sc_scalar_subcore>, window_params = []} {
    return
  }
}

module attributes {stable_mosaic.version = 11 : i64} {
  func.func private @main(%arg0: i32) attributes {dimension_semantics = [#tpu.dimension_semantics<core_parallel>], iteration_bounds = array<i64: 2>, tpu.core_type = #tpu.core_type<sc_scalar_subcore>, window_params = []} {
    return
  }
}

module attributes {stable_mosaic.version = 11 : i64} {
  func.func @_segmenter_kernel(%arg0: i32, %arg1: memref<1x4096x36xbf16, #tpu.memory_space<vmem>>, %arg2: memref<21x4096xbf16, #tpu.memory_space<vmem>>, %arg3: memref<21x1xf32, #tpu.memory_space<vmem>>, %arg4: memref<36x1024xf32, #tpu.memory_space<vmem>>, %arg5: memref<1x21x1024xf32, #tpu.memory_space<vmem>>) attributes {dimension_semantics = [#tpu.dimension_semantics<parallel>], iteration_bounds = array<i64: 2>, scalar_prefetch = 0 : i64, scratch_operands = 0 : i64, tpu.core_type = #tpu.core_type<tc>, window_params = [{transform_indices = @transform_0, window_bounds = array<i64: 1, 4096, 36>}, {pipeline_mode = #tpu.pipeline_mode<synchronous>, transform_indices = @transform_1, window_bounds = array<i64: 21, 4096>}, {pipeline_mode = #tpu.pipeline_mode<synchronous>, transform_indices = @transform_2, window_bounds = array<i64: 21, 1>}, {pipeline_mode = #tpu.pipeline_mode<synchronous>, transform_indices = @transform_3, window_bounds = array<i64: 36, 1024>}, {transform_indices = @transform_4, window_bounds = array<i64: 1, 21, 1024>}]} {
    %c0 = arith.constant 0 : index
    %c0_0 = arith.constant 0 : index
    %c0_1 = arith.constant 0 : index
    %0 = vector.load %arg1[%c0, %c0_0, %c0_1] : memref<1x4096x36xbf16, #tpu.memory_space<vmem>>, vector<1x4096x36xbf16>
    %1 = vector.shape_cast %0 : vector<1x4096x36xbf16> to vector<4096x36xbf16>
    %c0_2 = arith.constant 0 : index
    %c0_3 = arith.constant 0 : index
    %2 = vector.load %arg2[%c0_2, %c0_3] : memref<21x4096xbf16, #tpu.memory_space<vmem>>, vector<21x4096xbf16>
    %cst = arith.constant dense<0.000000e+00> : vector<21x36xf32>
    %3 = tpu.matmul %2, %1, %cst {dimension_numbers = #tpu.dot_dimension_numbers<[1], [0], [0], [1], [0, 0, 1, 1], [], []>} : vector<21x4096xbf16>, vector<4096x36xbf16>, vector<21x36xf32> -> vector<21x36xf32>
    %c0_4 = arith.constant 0 : index
    %c0_5 = arith.constant 0 : index
    %4 = vector.load %arg3[%c0_4, %c0_5] : memref<21x1xf32, #tpu.memory_space<vmem>>, vector<21x1xf32>
    %5 = vector.broadcast %4 : vector<21x1xf32> to vector<21x36xf32>
    %6 = arith.addf %3, %5 : vector<21x36xf32>
    %c0_6 = arith.constant 0 : index
    %c0_7 = arith.constant 0 : index
    %7 = vector.load %arg4[%c0_6, %c0_7] : memref<36x1024xf32, #tpu.memory_space<vmem>>, vector<36x1024xf32>
    %cst_8 = arith.constant dense<0.000000e+00> : vector<21x1024xf32>
    %8 = tpu.matmul %6, %7, %cst_8 {dimension_numbers = #tpu.dot_dimension_numbers<[1], [0], [0], [1], [0, 0, 1, 1], [], []>} : vector<21x36xf32>, vector<36x1024xf32>, vector<21x1024xf32> -> vector<21x1024xf32>
    %c0_9 = arith.constant 0 : index
    %c0_10 = arith.constant 0 : index
    %c0_11 = arith.constant 0 : index
    %9 = vector.load %arg5[%c0_9, %c0_10, %c0_11] : memref<1x21x1024xf32, #tpu.memory_space<vmem>>, vector<1x21x1024xf32>
    %10 = vector.shape_cast %9 : vector<1x21x1024xf32> to vector<21x1024xf32>
    %11 = vector.shape_cast %8 : vector<21x1024xf32> to vector<1x21x1024xf32>
    tpu.vector_store %arg5[%c0_9, %c0_10, %c0_11], %11 {strides = array<i32>} : memref<1x21x1024xf32, #tpu.memory_space<vmem>>, vector<1x21x1024xf32>,
    return
  }
  func.func @transform_0(%arg0: i32) -> (i32, i32, i32) {
    %c0_i32 = arith.constant 0 : i32
    %c0_i32_0 = arith.constant 0 : i32
    %c0_i32_1 = arith.constant 0 : i32
    return %arg0, %c0_i32, %c0_i32_0 : i32, i32, i32
  }
  func.func @transform_1(%arg0: i32) -> (i32, i32) {
    %c0_i32 = arith.constant 0 : i32
    %c0_i32_0 = arith.constant 0 : i32
    %c0_i32_1 = arith.constant 0 : i32
    return %c0_i32, %c0_i32_0 : i32, i32
  }
  func.func @transform_2(%arg0: i32) -> (i32, i32) {
    %c0_i32 = arith.constant 0 : i32
    %c0_i32_0 = arith.constant 0 : i32
    %c0_i32_1 = arith.constant 0 : i32
    return %c0_i32, %c0_i32_0 : i32, i32
  }
  func.func @transform_3(%arg0: i32) -> (i32, i32) {
    %c0_i32 = arith.constant 0 : i32
    %c0_i32_0 = arith.constant 0 : i32
    %c0_i32_1 = arith.constant 0 : i32
    return %c0_i32, %c0_i32_0 : i32, i32
  }
  func.func @transform_4(%arg0: i32) -> (i32, i32, i32) {
    %c0_i32 = arith.constant 0 : i32
    %c0_i32_0 = arith.constant 0 : i32
    %c0_i32_1 = arith.constant 0 : i32
    return %arg0, %c0_i32, %c0_i32_0 : i32, i32, i32
  }
}

</mosaic_0001>

<bundles_post_ra>
// kernel: alexnet_segmenter_forward.1
= control target key start
LH: loop header
LB: loop body
LE: loop exit
PB: predicated region body
PF: predicated region fallthrough
CT: control target
= control target key end

     0   :  { %s5006_s15 = smov 0   ;;  %s5670_s0 = inlined_call_operand.vmem [shape: bf16[2,4096,36], index: 0, kind: input, shape index: {}]   ;;  %s5671_s1 = inlined_call_operand.vmem [shape: bf16[21,4096], index: 1, kind: input, shape index: {}]   ;;  %s5672_s2 = inlined_call_operand.vmem [shape: f32[21,1], index: 2, kind: input, shape index: {}]   ;;  %s5673_s3 = inlined_call_operand.vmem [shape: f32[36,1024], index: 3, kind: input, shape index: {}]   ;;  %s5674_s4 = inlined_call_operand.vmem [shape: f32[2,21,1024], index: 4, kind: output, shape index: {}]  }
   0x1 LB: > { %s3839_s16 = sadd.s32 4294967295, %s4977_s15   ;;  %p3843_p0 = scmp.ge.s32.totalorder %s4977_s15, 1  ;;  %s4977_s15 = sphi %s5006_s15, %s14_s15  }
   0x2   : > { %p162_p1 = scmp.lt.s32.totalorder %s4977_s15, 3 }
   0x4   : > { %p163_p2 = pnand %p3843_p0, %p162_p1 }
   0x5   : > { %p188_p3 = scmp.lt.s32.totalorder (!%p163_p2), %s3839_s16, 1  ;;  %v5017_v0 = vld [vmem:[%s5671_s1] sm:$0xff] (!%p163_p2)  ;;  %v5027_v2 = vld [vmem:[%s5671_s1 + $0x8] sm:$0xff] (!%p163_p2)  ;;  %v4979_v5 = vmov (!%p163_p2), 0   ;;  %v5096_v50 = vld [vmem:[%s5671_s1 + $0x10] sm:$0xff] (!%p163_p2)  ;;  %vm3403_vm0 = vcmask (!%p163_p2), 1043456  }
   0x6   : > { %166 = sbr.rel (%p163_p2) target bundleno = 727 (0x2d7), region = 36  ;;  %v5022_v1 = vld [vmem:[%s5671_s1 + $0x80] sm:$0xff] (!%p163_p2)  ;;  %v5034_v4 = vld [vmem:[%s5671_s1 + $0x88] sm:$0xff] (!%p163_p2)  ;;  %4681 = vset.pattern.permute.xlu0 (!%p163_p2), %v4979_v5  ;;  %4682 = vset.pattern.permute.xlu1 (!%p163_p2), %v4979_v5  ;;  %v5101_v51 = vld [vmem:[%s5671_s1 + $0x90] sm:$0xff] (!%p163_p2)  ;;  %vm3393_vm1 = vcmask (!%p163_p2), 293888  }
   0x7   : > { %v3848_v3 = vcombine.high (!%p163_p2), %v5017_v0, %v5022_v1  ;;  %v3850_v6 = vcombine.high (!%p163_p2), %v5027_v2, %v5034_v4  ;;  %v743_v36 = vld [vmem:[%s5671_s1 + $0x100] sm:$0x77] (!%p163_p2)  ;;  %v744_v38 = vld [vmem:[%s5671_s1 + $0x108] sm:$0x77] (!%p163_p2)  ;;  %v3847_v41 = vcombine.low (!%p163_p2), %v5017_v0, %v5022_v1  ;;  %v3849_v42 = vcombine.low (!%p163_p2), %v5027_v2, %v5034_v4  ;;  %v5107_v53 = vld [vmem:[%s5671_s1 + $0x18] sm:$0xff] (!%p163_p2) }
   0x8   : > { %v3880_v45 = vcombine.high (!%p163_p2), %v743_v36, %v743_v36  ;;  %v3882_v47 = vcombine.high (!%p163_p2), %v744_v38, %v744_v38  ;;  %v5112_v54 = vld [vmem:[%s5671_s1 + $0x98] sm:$0xff] (!%p163_p2)  ;;  %v3879_v57 = vcombine.low (!%p163_p2), %v743_v36, %v743_v36  ;;  %v3881_v59 = vcombine.low (!%p163_p2), %v744_v38, %v744_v38  ;;  %v5178_v36 = vld [vmem:[%s5671_s1 + $0xa8] sm:$0xff] (!%p163_p2) }
   0x9   : > { %2617 = vmatprep.mubr.bf16.mxu0 (!%p163_p2), %v3848_v3  ;;  %2665 = vmatprep.mubr.bf16.mxu1 (!%p163_p2), %v3850_v6  ;;  %v3852_v61 = vcombine.high (!%p163_p2), %v5096_v50, %v5101_v51  ;;  %v3854_v63 = vcombine.high (!%p163_p2), %v5107_v53, %v5112_v54 }
   0xd   : > { %s5676_s16 = smov (!%p188_p3, %s3839_s16), 1 }
   0xe   : > { %s4189_s25 = sshll.u32 %s5676_s16, 11  ;;  %s4670_s12 = smul.u32 192, %s5676_s16 }
   0xf   : > { %s5044_s28 = scalar_lea.vmem %s5670_s0, %s4189_s25 }
  0x10   : > { %v4683_v7 = vld [vmem:[%s5044_s28 + $0x40] sm:$0xff]   ;;  %v4687_v11 = vld [vmem:[%s5044_s28 + $0x48] sm:$0xff]   ;;  %v4691_v15 = vld [vmem:[%s5044_s28 + $0x50] sm:$0xff]   ;;  %s5641_s17 = scalar_lea.vmem %s5674_s4, %s4670_s12 }
  0x11   : > { %v4684_v8 = vld [vmem:[%s5044_s28 + $0xc0] sm:$0xff]   ;;  %4190 = vmatprep.subr.bf16.mxu0 %v4683_v7  ;;  %v4688_v12 = vld [vmem:[%s5044_s28 + $0xc8] sm:$0xff]   ;;  %v4692_v16 = vld [vmem:[%s5044_s28 + $0xd0] sm:$0xff]  }
  0x12   : > { %v4685_v9 = vld [vmem:[%s5044_s28] sm:$0xff]   ;;  %4218 = vmatprep.subr.bf16.mxu1 %v4684_v8  ;;  %v4689_v13 = vld [vmem:[%s5044_s28 + $0x8] sm:$0xff]   ;;  %v4693_v17 = vld [vmem:[%s5044_s28 + $0x10] sm:$0xff]  }
  0x13   : > { %v4686_v10 = vld [vmem:[%s5044_s28 + $0x80] sm:$0xff]   ;;  %4191 = vmatpush3.bf16.msra.mxu0 %v4685_v9  ;;  %v4690_v14 = vld [vmem:[%s5044_s28 + $0x88] sm:$0xff]   ;;  %v4694_v18 = vld [vmem:[%s5044_s28 + $0x90] sm:$0xff]  }
  0x14   : > { %4219 = vmatpush3.bf16.msra.mxu1 %v4686_v10  ;;  %4192 = vmatprep.subr.bf16.mxu0 %v4687_v11  ;;  %v4695_v19 = vld [vmem:[%s5044_s28 + $0x58] sm:$0xff]   ;;  %v4699_v23 = vld [vmem:[%s5044_s28 + $0x60] sm:$0xff]   ;;  %v4703_v27 = vld [vmem:[%s5044_s28 + $0x68] sm:$0xff]  }
  0x15   : > { %4220 = vmatprep.subr.bf16.mxu1 %v4688_v12  ;;  %v4696_v20 = vld [vmem:[%s5044_s28 + $0xd8] sm:$0xff]   ;;  %v4700_v24 = vld [vmem:[%s5044_s28 + $0xe0] sm:$0xff]   ;;  %v4704_v28 = vld [vmem:[%s5044_s28 + $0xe8] sm:$0xff]  }
  0x16   : > { %v4697_v21 = vld [vmem:[%s5044_s28 + $0x18] sm:$0xff]   ;;  %v4701_v25 = vld [vmem:[%s5044_s28 + $0x20] sm:$0xff]   ;;  %v4705_v29 = vld [vmem:[%s5044_s28 + $0x28] sm:$0xff]  }
  0x17   : > { %4193 = vmatpush3.bf16.msra.mxu0 %v4689_v13  ;;  %v4698_v22 = vld [vmem:[%s5044_s28 + $0x98] sm:$0xff]   ;;  %v4702_v26 = vld [vmem:[%s5044_s28 + $0xa0] sm:$0xff]   ;;  %v4706_v30 = vld [vmem:[%s5044_s28 + $0xa8] sm:$0xff]  }
  0x18   : > { %4221 = vmatpush3.bf16.msra.mxu1 %v4690_v14  ;;  %4194 = vmatprep.subr.bf16.mxu0 %v4691_v15  ;;  %v4707_v31 = vld [vmem:[%s5044_s28 + $0x70] sm:$0xff]   ;;  %v4711_v35 = vld [vmem:[%s5044_s28 + $0x78] sm:$0xff]   ;;  %v4715_v43 = vld [vmem:[%s5044_s28 + $0x140] sm:$0xff]  }
  0x19   : > { %4222 = vmatprep.subr.bf16.mxu1 %v4692_v16  ;;  %v4708_v32 = vld [vmem:[%s5044_s28 + $0xf0] sm:$0xff]   ;;  %v4712_v37 = vld [vmem:[%s5044_s28 + $0xf8] sm:$0xff]   ;;  %v4716_v44 = vld [vmem:[%s5044_s28 + $0x1c0] sm:$0xff]  }
  0x1a   : > { %v4709_v33 = vld [vmem:[%s5044_s28 + $0x30] sm:$0xff]   ;;  %v4713_v39 = vld [vmem:[%s5044_s28 + $0x38] sm:$0xff]   ;;  %v4717_v46 = vld [vmem:[%s5044_s28 + $0x100] sm:$0xff]  }
  0x1b   : > { %4195 = vmatpush3.bf16.msra.mxu0 %v4693_v17  ;;  %v4710_v34 = vld [vmem:[%s5044_s28 + $0xb0] sm:$0xff]   ;;  %v4714_v40 = vld [vmem:[%s5044_s28 + $0xb8] sm:$0xff]   ;;  %v4718_v48 = vld [vmem:[%s5044_s28 + $0x180] sm:$0xff]  }
  0x1c   : > { %4223 = vmatpush3.bf16.msra.mxu1 %v4694_v18  ;;  %4196 = vmatprep.subr.bf16.mxu0 %v4695_v19  ;;  %v4719_v49 = vld [vmem:[%s5044_s28 + $0x148] sm:$0xff]   ;;  %v4723_v58 = vld [vmem:[%s5044_s28 + $0x150] sm:$0xff]   ;;  %v4727_v1 = vld [vmem:[%s5044_s28 + $0x158] sm:$0xff]  }
  0x1d   : > { %4224 = vmatprep.subr.bf16.mxu1 %v4696_v20  ;;  %v4720_v52 = vld [vmem:[%s5044_s28 + $0x1c8] sm:$0xff]   ;;  %v4724_v60 = vld [vmem:[%s5044_s28 + $0x1d0] sm:$0xff]   ;;  %v4728_v2 = vld [vmem:[%s5044_s28 + $0x1d8] sm:$0xff]  }
  0x1e   : > { %v4721_v55 = vld [vmem:[%s5044_s28 + $0x108] sm:$0xff]   ;;  %v4725_v62 = vld [vmem:[%s5044_s28 + $0x110] sm:$0xff]   ;;  %v4729_v3 = vld [vmem:[%s5044_s28 + $0x118] sm:$0xff]  }
  0x1f   : > { %4197 = vmatpush3.bf16.msra.mxu0 %v4697_v21  ;;  %v4722_v56 = vld [vmem:[%s5044_s28 + $0x188] sm:$0xff]   ;;  %v4726_v0 = vld [vmem:[%s5044_s28 + $0x190] sm:$0xff]   ;;  %v4730_v4 = vld [vmem:[%s5044_s28 + $0x198] sm:$0xff]  }
  0x20   : > { %4225 = vmatpush3.bf16.msra.mxu1 %v4698_v22  ;;  %4198 = vmatprep.subr.bf16.mxu0 %v4699_v23  ;;  %v4731_v5 = vld [vmem:[%s5044_s28 + $0x160] sm:$0xff]   ;;  %v4735_v9 = vld [vmem:[%s5044_s28 + $0x168] sm:$0xff]   ;;  %v4743_v13 = vld [vmem:[%s5044_s28 + $0x170] sm:$0xff]   ;;  %v3851_v23 = vcombine.low %v5096_v50, %v5101_v51 }
  0x21   : > { %4226 = vmatprep.subr.bf16.mxu1 %v4700_v24  ;;  %v4732_v6 = vld [vmem:[%s5044_s28 + $0x1e0] sm:$0xff]   ;;  %v4736_v10 = vld [vmem:[%s5044_s28 + $0x1e8] sm:$0xff]   ;;  %v4744_v14 = vld [vmem:[%s5044_s28 + $0x1f0] sm:$0xff]   ;;  %v3853_v24 = vcombine.low %v5107_v53, %v5112_v54 }
  0x22   : > { %v4733_v7 = vld [vmem:[%s5044_s28 + $0x120] sm:$0xff]   ;;  %v4738_v11 = vld [vmem:[%s5044_s28 + $0x128] sm:$0xff]   ;;  %v4745_v15 = vld [vmem:[%s5044_s28 + $0x130] sm:$0xff]  }
  0x23   : > { %4199 = vmatpush3.bf16.msra.mxu0 %v4701_v25  ;;  %v4734_v8 = vld [vmem:[%s5044_s28 + $0x1a0] sm:$0xff]   ;;  %v4739_v12 = vld [vmem:[%s5044_s28 + $0x1a8] sm:$0xff]   ;;  %v4746_v16 = vld [vmem:[%s5044_s28 + $0x1b0] sm:$0xff]  }
  0x24   : > { %4227 = vmatpush3.bf16.msra.mxu1 %v4702_v26  ;;  %4200 = vmatprep.subr.bf16.mxu0 %v4703_v27  ;;  %v4747_v17 = vld [vmem:[%s5044_s28 + $0x178] sm:$0xff]   ;;  %v745_v18 = vld [vmem:[%s5671_s1 + $0x110] sm:$0x77]  ;;  %v4751_v25 = vld [vmem:[%s5044_s28 + $0x240] sm:$0xff]  }
  0x25   : > { %4228 = vmatprep.subr.bf16.mxu1 %v4704_v28  ;;  %v4748_v19 = vld [vmem:[%s5044_s28 + $0x1f8] sm:$0xff]   ;;  %v4752_v26 = vld [vmem:[%s5044_s28 + $0x2c0] sm:$0xff]   ;;  %v3884_v27 = vcombine.high %v745_v18, %v745_v18  ;;  %v4758_v38 = vld [vmem:[%s5044_s28 + $0x288] sm:$0xff]  }
  0x26   : > { %v746_v20 = vld [vmem:[%s5671_s1 + $0x118] sm:$0x77]  ;;  %v4753_v28 = vld [vmem:[%s5044_s28 + $0x200] sm:$0xff]  }
  0x27   : > { %4201 = vmatpush3.bf16.msra.mxu0 %v4705_v29  ;;  %v4749_v21 = vld [vmem:[%s5044_s28 + $0x138] sm:$0xff]   ;;  %v3886_v29 = vcombine.high %v746_v20, %v746_v20  ;;  %v4771_v51 = vld [vmem:[%s5044_s28 + $0x260] sm:$0xff]  }
  0x28   : > { %4229 = vmatpush3.bf16.msra.mxu1 %v4706_v30  ;;  %4202 = vmatprep.subr.bf16.mxu0 %v4707_v31  ;;  %v4750_v22 = vld [vmem:[%s5044_s28 + $0x1b8] sm:$0xff]   ;;  %v4754_v30 = vld [vmem:[%s5044_s28 + $0x280] sm:$0xff]   ;;  %v4755_v31 = vld [vmem:[%s5044_s28 + $0x248] sm:$0xff]  }
  0x29   : > { %4230 = vmatprep.subr.bf16.mxu1 %v4708_v32  ;;  %v5162_v32 = vld [vmem:[%s5671_s1 + $0x20] sm:$0xff]  ;;  %v4770_v50 = vld [vmem:[%s5044_s28 + $0x298] sm:$0xff]  }
  0x2a   : > { %v4773_v53 = vld [vmem:[%s5044_s28 + $0x220] sm:$0xff]  }
  0x2b   : > { %4203 = vmatpush3.bf16.msra.mxu0 %v4709_v33  ;;  %v5167_v33 = vld [vmem:[%s5671_s1 + $0xa0] sm:$0xff] }
  0x2c   : > { %4231 = vmatpush3.bf16.msra.mxu1 %v4710_v34  ;;  %4204 = vmatprep.subr.bf16.mxu0 %v4711_v35  ;;  %v4756_v34 = vld [vmem:[%s5044_s28 + $0x2c8] sm:$0xff]   ;;  %v4774_v54 = vld [vmem:[%s5044_s28 + $0x2a0] sm:$0xff]  }
  0x2d   : > { %4232 = vmatprep.subr.bf16.mxu1 %v4712_v37  ;;  %v5173_v35 = vld [vmem:[%s5671_s1 + $0x28] sm:$0xff] }
  0x2e   : > { %v4757_v37 = vld [vmem:[%s5044_s28 + $0x208] sm:$0xff]  }
  0x2f   : > { %4205 = vmatpush3.bf16.msra.mxu0 %v4713_v39  ;;  %v3883_v39 = vcombine.low %v745_v18, %v745_v18  ;;  %v4797_v18 = vld [vmem:[%s5044_s28 + $0x350] sm:$0xff]  }
  0x30   : > { %4233 = vmatpush3.bf16.msra.mxu1 %v4714_v40  ;;  %4246 = vmatprep.subr.bf16.mxu0 %v4715_v43  ;;  %v4761_v40 = vld [vmem:[%s5044_s28 + $0x250] sm:$0xff]   ;;  %v3856_v43 = vcombine.high %v5162_v32, %v5167_v33 }
  0x31   : > { %4274 = vmatprep.subr.bf16.mxu1 %v4716_v44  ;;  %v4764_v44 = vld [vmem:[%s5044_s28 + $0x210] sm:$0xff]  }
  0x32   : > { %2618 = vmatmul.mubr.bf16.vlgmr.msra.gmra.mrb[0].mxu0 %v3847_v41  ;;  %v3885_v41 = vcombine.low %v746_v20, %v746_v20  ;;  %v4798_v20 = vld [vmem:[%s5044_s28 + $0x3d0] sm:$0xff]  }
  0x33   : > { %2666 = vmatmul.mubr.bf16.vlgmr.msra.gmra.mrb[0].mxu1 %v3849_v42  ;;  %4247 = vmatpush3.bf16.msra.mxu0 %v4717_v46  ;;  %v4762_v42 = vld [vmem:[%s5044_s28 + $0x2d0] sm:$0xff]  }
  0x34   : > { %4275 = vmatpush3.bf16.msra.mxu1 %v4718_v48  ;;  %2625 = vmatprep.mubr.bf16.mxu0 %v3880_v45  ;;  %v3858_v45 = vcombine.high %v5173_v35, %v5178_v36  ;;  %v4765_v46 = vld [vmem:[%s5044_s28 + $0x290] sm:$0xff]   ;;  %v4768_v48 = vld [vmem:[%s5044_s28 + $0x2d8] sm:$0xff]  }
  0x35   : > { %4248 = vmatprep.subr.bf16.mxu0 %v4719_v49  ;;  %2673 = vmatprep.mubr.bf16.mxu1 %v3882_v47  ;;  %v4767_v47 = vld [vmem:[%s5044_s28 + $0x258] sm:$0xff]  }
  0x36   : > { %4276 = vmatprep.subr.bf16.mxu1 %v4720_v52  ;;  %v4769_v49 = vld [vmem:[%s5044_s28 + $0x218] sm:$0xff]   ;;  %v4772_v52 = vld [vmem:[%s5044_s28 + $0x2e0] sm:$0xff]  }
  0x37   : > { %4249 = vmatpush3.bf16.msra.mxu0 %v4721_v55  ;;  %v4775_v55 = vld [vmem:[%s5044_s28 + $0x268] sm:$0xff]  }
  0x38   : > { %4277 = vmatpush3.bf16.msra.mxu1 %v4722_v56  ;;  %4250 = vmatprep.subr.bf16.mxu0 %v4723_v58  ;;  %v4776_v56 = vld [vmem:[%s5044_s28 + $0x2e8] sm:$0xff]  }
  0x39   : > { %4278 = vmatprep.subr.bf16.mxu1 %v4724_v60  ;;  %v4778_v58 = vld [vmem:[%s5044_s28 + $0x2a8] sm:$0xff]   ;;  %v4780_v60 = vld [vmem:[%s5044_s28 + $0x2f0] sm:$0xff]  }
  0x3a   : > { %2626 = vmatmul.mubr.bf16.gmra.mrb[4].mxu0 %v3879_v57  ;;  %v4777_v57 = vld [vmem:[%s5044_s28 + $0x228] sm:$0xff]  }
  0x3b   : > { %4251 = vmatpush3.bf16.msra.mxu0 %v4725_v62  ;;  %2674 = vmatmul.mubr.bf16.gmra.mrb[4].mxu1 %v3881_v59  ;;  %v4779_v59 = vld [vmem:[%s5044_s28 + $0x270] sm:$0xff]  }
  0x3c   : > { %4279 = vmatpush3.bf16.msra.mxu1 %v4726_v0  ;;  %2713 = vmatprep.mubr.bf16.mxu0 %v3852_v61  ;;  %v4781_v61 = vld [vmem:[%s5044_s28 + $0x230] sm:$0xff]   ;;  %v747_v0 = vld [vmem:[%s5671_s1 + $0x120] sm:$0x77] }
  0x3d   : > { %4252 = vmatprep.subr.bf16.mxu0 %v4727_v1  ;;  %2761 = vmatprep.mubr.bf16.mxu1 %v3854_v63  ;;  %v4782_v62 = vld [vmem:[%s5044_s28 + $0x2b0] sm:$0xff]   ;;  %v4783_v63 = vld [vmem:[%s5044_s28 + $0x278] sm:$0xff]  }
  0x3e   : > { %4280 = vmatprep.subr.bf16.mxu1 %v4728_v2  ;;  %v4784_v1 = vld [vmem:[%s5044_s28 + $0x2f8] sm:$0xff]   ;;  %v748_v2 = vld [vmem:[%s5671_s1 + $0x128] sm:$0x77] }
  0x3f   : > { %4253 = vmatpush3.bf16.msra.mxu0 %v4729_v3  ;;  %v4785_v3 = vld [vmem:[%s5044_s28 + $0x238] sm:$0xff]  }
  0x40   : > { %4281 = vmatpush3.bf16.msra.mxu1 %v4730_v4  ;;  %4254 = vmatprep.subr.bf16.mxu0 %v4731_v5  ;;  %v4786_v4 = vld [vmem:[%s5044_s28 + $0x2b8] sm:$0xff]   ;;  %v3855_v5 = vcombine.low %v5162_v32, %v5167_v33  ;;  %v4812_v32 = vld [vmem:[%s5044_s28 + $0x3e8] sm:$0xff]   ;;  %v759_v33 = vld [vmem:[%s5672_s2] sm:$0xff] }
  0x41   : > { %4282 = vmatprep.subr.bf16.mxu1 %v4732_v6  ;;  %v3857_v6 = vcombine.low %v5173_v35, %v5178_v36  ;;  %764 = vperm.xlu0 %4681, %v759_v33   ;;  %v4814_v35 = vld [vmem:[%s5044_s28 + $0x3a8] sm:$0xff]   ;;  %v4815_v36 = vld [vmem:[%s5044_s28 + $0x370] sm:$0xff]  }
  0x42   : > { %v736_v33 = vld [vmem:[%s5671_s1 + $0xc8] sm:$0xff] }
  0x43   : > { %4255 = vmatpush3.bf16.msra.mxu0 %v4733_v7  ;;  %v4787_v7 = vld [vmem:[%s5044_s28 + $0x340] sm:$0xff]  }
  0x44   : > { %4283 = vmatpush3.bf16.msra.mxu1 %v4734_v8  ;;  %4256 = vmatprep.subr.bf16.mxu0 %v4735_v9  ;;  %v4788_v8 = vld [vmem:[%s5044_s28 + $0x3c0] sm:$0xff]   ;;  %v3888_v9 = vcombine.high %v747_v0, %v747_v0 }
  0x45   : > { %4284 = vmatprep.subr.bf16.mxu1 %v4736_v10  ;;  %v4789_v10 = vld [vmem:[%s5044_s28 + $0x300] sm:$0xff]  }
  0x47   : > { %4257 = vmatpush3.bf16.msra.mxu0 %v4738_v11  ;;  %v3890_v11 = vcombine.high %v748_v2, %v748_v2 }
  0x48   : > { %4285 = vmatpush3.bf16.msra.mxu1 %v4739_v12  ;;  %4258 = vmatprep.subr.bf16.mxu0 %v4743_v13  ;;  %v4790_v12 = vld [vmem:[%s5044_s28 + $0x380] sm:$0xff]   ;;  %v4791_v13 = vld [vmem:[%s5044_s28 + $0x348] sm:$0xff]  }
  0x49   : > { %4286 = vmatprep.subr.bf16.mxu1 %v4744_v14  ;;  %v4792_v14 = vld [vmem:[%s5044_s28 + $0x3c8] sm:$0xff]  }
  0x4b   : > { %4259 = vmatpush3.bf16.msra.mxu0 %v4745_v15  ;;  %v4793_v15 = vld [vmem:[%s5044_s28 + $0x308] sm:$0xff]  }
  0x4c   : > { %4287 = vmatpush3.bf16.msra.mxu1 %v4746_v16  ;;  %4260 = vmatprep.subr.bf16.mxu0 %v4747_v17  ;;  %v4794_v16 = vld [vmem:[%s5044_s28 + $0x388] sm:$0xff]   ;;  %v3887_v17 = vcombine.low %v747_v0, %v747_v0  ;;  %v4833_v0 = vld [vmem:[%s5044_s28 + $0x450] sm:$0xff]  }
  0x4d   : > { %4288 = vmatprep.subr.bf16.mxu1 %v4748_v19  ;;  %v3889_v19 = vcombine.low %v748_v2, %v748_v2  ;;  %v750_v2 = vld [vmem:[%s5671_s1 + $0x138] sm:$0x77] }
  0x4f   : > { %4261 = vmatpush3.bf16.msra.mxu0 %v4749_v21  ;;  %v4800_v21 = vld [vmem:[%s5044_s28 + $0x310] sm:$0xff]  }
  0x50   : > { %4289 = vmatpush3.bf16.msra.mxu1 %v4750_v22  ;;  %4302 = vmatprep.subr.bf16.mxu0 %v4751_v25  ;;  %v4801_v22 = vld [vmem:[%s5044_s28 + $0x390] sm:$0xff]   ;;  %v4805_v25 = vld [vmem:[%s5044_s28 + $0x318] sm:$0xff]  }
  0x51   : > { %4330 = vmatprep.subr.bf16.mxu1 %v4752_v26  ;;  %v4806_v26 = vld [vmem:[%s5044_s28 + $0x398] sm:$0xff]  }
  0x52   : > { %2714 = vmatmul.mubr.bf16.vlgmr.msra.gmra.mrb[8].mxu0 %v3851_v23  ;;  %v4803_v23 = vld [vmem:[%s5044_s28 + $0x358] sm:$0xff]  }
  0x53   : > { %2762 = vmatmul.mubr.bf16.vlgmr.msra.gmra.mrb[8].mxu1 %v3853_v24  ;;  %4303 = vmatpush3.bf16.msra.mxu0 %v4753_v28  ;;  %v4804_v24 = vld [vmem:[%s5044_s28 + $0x3d8] sm:$0xff]   ;;  %v4808_v28 = vld [vmem:[%s5044_s28 + $0x3e0] sm:$0xff]  }
  0x54   : > { %4331 = vmatpush3.bf16.msra.mxu1 %v4754_v30  ;;  %2721 = vmatprep.mubr.bf16.mxu0 %v3884_v27  ;;  %v4807_v27 = vld [vmem:[%s5044_s28 + $0x360] sm:$0xff]  }
  0x55   : > { %4304 = vmatprep.subr.bf16.mxu0 %v4755_v31  ;;  %2769 = vmatprep.mubr.bf16.mxu1 %v3886_v29  ;;  %v4809_v29 = vld [vmem:[%s5044_s28 + $0x320] sm:$0xff]   ;;  %v4811_v31 = vld [vmem:[%s5044_s28 + $0x368] sm:$0xff]  }
  0x56   : > { %4332 = vmatprep.subr.bf16.mxu1 %v4756_v34  ;;  %v4810_v30 = vld [vmem:[%s5044_s28 + $0x3a0] sm:$0xff]   ;;  %v4813_v34 = vld [vmem:[%s5044_s28 + $0x328] sm:$0xff]  }
  0x57   : > { %4305 = vmatpush3.bf16.msra.mxu0 %v4757_v37  ;;  %v4816_v37 = vld [vmem:[%s5044_s28 + $0x3f0] sm:$0xff]  }
  0x58   : > { %4333 = vmatpush3.bf16.msra.mxu1 %v4758_v38  ;;  %4306 = vmatprep.subr.bf16.mxu0 %v4761_v40  ;;  %v760_v38 = vld [vmem:[%s5672_s2 + $0x8] sm:$0xff]  ;;  %v4818_v40 = vld [vmem:[%s5044_s28 + $0x3b0] sm:$0xff]  }
  0x59   : > { %4334 = vmatprep.subr.bf16.mxu1 %v4762_v42  ;;  %769 = vperm.xlu0 %4681, %v760_v38   ;;  %v4820_v42 = vld [vmem:[%s5044_s28 + $0x3f8] sm:$0xff]   ;;  %v4861_v38 = vld [vmem:[%s5044_s28 + $0x500] sm:$0xff]  }
  0x5a   : > { %2722 = vmatmul.mubr.bf16.gmra.mrb[12].mxu0 %v3883_v39  ;;  %v4817_v39 = vld [vmem:[%s5044_s28 + $0x330] sm:$0xff]  }
  0x5b   : > { %4307 = vmatpush3.bf16.msra.mxu0 %v4764_v44  ;;  %2770 = vmatmul.mubr.bf16.gmra.mrb[12].mxu1 %v3885_v41  ;;  %v4819_v41 = vld [vmem:[%s5044_s28 + $0x378] sm:$0xff]  }
  0x5c   : > { %4335 = vmatpush3.bf16.msra.mxu1 %v4765_v46  ;;  %2809 = vmatprep.mubr.bf16.mxu0 %v3856_v43  ;;  %v4821_v43 = vld [vmem:[%s5044_s28 + $0x338] sm:$0xff]   ;;  %v733_v46 = vld [vmem:[%s5671_s1 + $0xb0] sm:$0xff] }
  0x5d   : > { %4308 = vmatprep.subr.bf16.mxu0 %v4767_v47  ;;  %2857 = vmatprep.mubr.bf16.mxu1 %v3858_v45  ;;  %v4822_v44 = vld [vmem:[%s5044_s28 + $0x3b8] sm:$0xff]   ;;  %v717_v45 = vld [vmem:[%s5671_s1 + $0x30] sm:$0xff] }
  0x5e   : > { %4336 = vmatprep.subr.bf16.mxu1 %v4768_v48  ;;  %v718_v47 = vld [vmem:[%s5671_s1 + $0x38] sm:$0xff] }
  0x5f   : > { %4309 = vmatpush3.bf16.msra.mxu0 %v4769_v49  ;;  %v734_v48 = vld [vmem:[%s5671_s1 + $0xb8] sm:$0xff]  ;;  %v3859_v49 = vcombine.low %v717_v45, %v733_v46 }
  0x60   : > { %4337 = vmatpush3.bf16.msra.mxu1 %v4770_v50  ;;  %4310 = vmatprep.subr.bf16.mxu0 %v4771_v51  ;;  %v3860_v50 = vcombine.high %v717_v45, %v733_v46  ;;  %v3861_v51 = vcombine.low %v718_v47, %v734_v48 }
  0x61   : > { %4338 = vmatprep.subr.bf16.mxu1 %v4772_v52  ;;  %v3862_v52 = vcombine.high %v718_v47, %v734_v48  ;;  %v4869_v47 = vld [vmem:[%s5044_s28 + $0x550] sm:$0xff]  }
  0x62   : > { %v4870_v48 = vld [vmem:[%s5044_s28 + $0x5d0] sm:$0xff]  }
  0x63   : > { %4311 = vmatpush3.bf16.msra.mxu0 %v4773_v53  ;;  %v4823_v53 = vld [vmem:[%s5044_s28 + $0x440] sm:$0xff]  }
  0x64   : > { %4339 = vmatpush3.bf16.msra.mxu1 %v4774_v54  ;;  %4312 = vmatprep.subr.bf16.mxu0 %v4775_v55  ;;  %v4824_v54 = vld [vmem:[%s5044_s28 + $0x4c0] sm:$0xff]  }
  0x65   : > { %4340 = vmatprep.subr.bf16.mxu1 %v4776_v56  ;;  %v4825_v55 = vld [vmem:[%s5044_s28 + $0x400] sm:$0xff]  }
  0x66   : > { %v4826_v56 = vld [vmem:[%s5044_s28 + $0x480] sm:$0xff]  }
  0x67   : > { %4313 = vmatpush3.bf16.msra.mxu0 %v4777_v57  ;;  %v4827_v57 = vld [vmem:[%s5044_s28 + $0x448] sm:$0xff]  }
  0x68   : > { %4341 = vmatpush3.bf16.msra.mxu1 %v4778_v58  ;;  %4314 = vmatprep.subr.bf16.mxu0 %v4779_v59  ;;  %v4828_v58 = vld [vmem:[%s5044_s28 + $0x4c8] sm:$0xff]  }
  0x69   : > { %4342 = vmatprep.subr.bf16.mxu1 %v4780_v60  ;;  %v4829_v59 = vld [vmem:[%s5044_s28 + $0x408] sm:$0xff]  }
  0x6a   : > { %v4830_v60 = vld [vmem:[%s5044_s28 + $0x488] sm:$0xff]  }
  0x6b   : > { %4315 = vmatpush3.bf16.msra.mxu0 %v4781_v61  ;;  %v749_v61 = vld [vmem:[%s5671_s1 + $0x130] sm:$0x77] }
  0x6c   : > { %4343 = vmatpush3.bf16.msra.mxu1 %v4782_v62  ;;  %4316 = vmatprep.subr.bf16.mxu0 %v4783_v63  ;;  %v3892_v62 = vcombine.high %v749_v61, %v749_v61  ;;  %v3891_v63 = vcombine.low %v749_v61, %v749_v61  ;;  %v4882_v61 = vld [vmem:[%s5044_s28 + $0x5a0] sm:$0xff]  }
  0x6d   : > { %4344 = vmatprep.subr.bf16.mxu1 %v4784_v1  ;;  %v4834_v1 = vld [vmem:[%s5044_s28 + $0x4d0] sm:$0xff]  }
  0x6f   : > { %4317 = vmatpush3.bf16.msra.mxu0 %v4785_v3  ;;  %v3894_v3 = vcombine.high %v750_v2, %v750_v2 }
  0x70   : > { %4345 = vmatpush3.bf16.msra.mxu1 %v4786_v4  ;;  %4358 = vmatprep.subr.bf16.mxu0 %v4787_v7  ;;  %v4836_v4 = vld [vmem:[%s5044_s28 + $0x410] sm:$0xff]   ;;  %v4839_v7 = vld [vmem:[%s5044_s28 + $0x458] sm:$0xff]  }
  0x71   : > { %4386 = vmatprep.subr.bf16.mxu1 %v4788_v8  ;;  %v4840_v8 = vld [vmem:[%s5044_s28 + $0x4d8] sm:$0xff]  }
  0x72   : > { %2810 = vmatmul.mubr.bf16.vlgmr.msra.gmra.mrb[16].mxu0 %v3855_v5  ;;  %v3893_v5 = vcombine.low %v750_v2, %v750_v2  ;;  %v4887_v2 = vld [vmem:[%s5044_s28 + $0x570] sm:$0xff]  }
  0x73   : > { %2858 = vmatmul.mubr.bf16.vlgmr.msra.gmra.mrb[16].mxu1 %v3857_v6  ;;  %4359 = vmatpush3.bf16.msra.mxu0 %v4789_v10  ;;  %v4837_v6 = vld [vmem:[%s5044_s28 + $0x490] sm:$0xff]   ;;  %v4842_v10 = vld [vmem:[%s5044_s28 + $0x498] sm:$0xff]  }
  0x74   : > { %4387 = vmatpush3.bf16.msra.mxu1 %v4790_v12  ;;  %2817 = vmatprep.mubr.bf16.mxu0 %v3888_v9  ;;  %v4841_v9 = vld [vmem:[%s5044_s28 + $0x418] sm:$0xff]   ;;  %v4843_v12 = vld [vmem:[%s5044_s28 + $0x460] sm:$0xff]  }
  0x75   : > { %4360 = vmatprep.subr.bf16.mxu0 %v4791_v13  ;;  %2865 = vmatprep.mubr.bf16.mxu1 %v3890_v11  ;;  %v761_v11 = vld [vmem:[%s5672_s2 + $0x10] sm:$0x1f]  ;;  %v4844_v13 = vld [vmem:[%s5044_s28 + $0x4e0] sm:$0xff]  }
  0x76   : > { %4388 = vmatprep.subr.bf16.mxu1 %v4792_v14  ;;  %774 = vperm.xlu1 %4682, %v761_v11   ;;  %v4845_v14 = vld [vmem:[%s5044_s28 + $0x420] sm:$0xff]   ;;  %v737_v11 = vld [vmem:[%s5671_s1 + $0xd0] sm:$0xff] }
  0x77   : > { %4361 = vmatpush3.bf16.msra.mxu0 %v4793_v15  ;;  %v4846_v15 = vld [vmem:[%s5044_s28 + $0x4a0] sm:$0xff]  }
  0x78   : > { %4389 = vmatpush3.bf16.msra.mxu1 %v4794_v16  ;;  %4362 = vmatprep.subr.bf16.mxu0 %v4797_v18  ;;  %v4847_v16 = vld [vmem:[%s5044_s28 + $0x468] sm:$0xff]  }
  0x79   : > { %4390 = vmatprep.subr.bf16.mxu1 %v4798_v20  ;;  %v4849_v18 = vld [vmem:[%s5044_s28 + $0x428] sm:$0xff]   ;;  %v4851_v20 = vld [vmem:[%s5044_s28 + $0x470] sm:$0xff]  }
  0x7a   : > { %2818 = vmatmul.mubr.bf16.gmra.mrb[20].mxu0 %v3887_v17  ;;  %v4848_v17 = vld [vmem:[%s5044_s28 + $0x4e8] sm:$0xff]  }
  0x7b   : > { %4363 = vmatpush3.bf16.msra.mxu0 %v4800_v21  ;;  %2866 = vmatmul.mubr.bf16.gmra.mrb[20].mxu1 %v3889_v19  ;;  %v4850_v19 = vld [vmem:[%s5044_s28 + $0x4a8] sm:$0xff]   ;;  %v4852_v21 = vld [vmem:[%s5044_s28 + $0x4f0] sm:$0xff]  }
  0x7c   : > { %4391 = vmatpush3.bf16.msra.mxu1 %v4801_v22  ;;  %4364 = vmatprep.subr.bf16.mxu0 %v4803_v23  ;;  %v4853_v22 = vld [vmem:[%s5044_s28 + $0x430] sm:$0xff]  }
  0x7d   : > { %4392 = vmatprep.subr.bf16.mxu1 %v4804_v24  ;;  %2905 = vmatprep.mubr.bf16.mxu0 %v3860_v50  ;;  %v4854_v23 = vld [vmem:[%s5044_s28 + $0x4b0] sm:$0xff]   ;;  %v4855_v24 = vld [vmem:[%s5044_s28 + $0x478] sm:$0xff]  }
  0x7e   : > { %2953 = vmatprep.mubr.bf16.mxu1 %v3862_v52 }
  0x7f   : > { %4365 = vmatpush3.bf16.msra.mxu0 %v4805_v25  ;;  %v4856_v25 = vld [vmem:[%s5044_s28 + $0x4f8] sm:$0xff]  }
  0x80   : > { %4393 = vmatpush3.bf16.msra.mxu1 %v4806_v26  ;;  %4366 = vmatprep.subr.bf16.mxu0 %v4807_v27  ;;  %v4857_v26 = vld [vmem:[%s5044_s28 + $0x438] sm:$0xff]  }
  0x81   : > { %4394 = vmatprep.subr.bf16.mxu1 %v4808_v28  ;;  %v4858_v27 = vld [vmem:[%s5044_s28 + $0x4b8] sm:$0xff]   ;;  %v719_v28 = vld [vmem:[%s5671_s1 + $0x40] sm:$0xff] }
  0x83   : > { %4367 = vmatpush3.bf16.msra.mxu0 %v4809_v29  ;;  %v735_v29 = vld [vmem:[%s5671_s1 + $0xc0] sm:$0xff] }
  0x84   : > { %4395 = vmatpush3.bf16.msra.mxu1 %v4810_v30  ;;  %4368 = vmatprep.subr.bf16.mxu0 %v4811_v31  ;;  %v720_v30 = vld [vmem:[%s5671_s1 + $0x48] sm:$0xff]  ;;  %v3863_v31 = vcombine.low %v719_v28, %v735_v29 }
  0x85   : > { %4396 = vmatprep.subr.bf16.mxu1 %v4812_v32  ;;  %v3864_v32 = vcombine.high %v719_v28, %v735_v29  ;;  %v4905_v29 = vld [vmem:[%s5044_s28 + $0x650] sm:$0xff]  }
  0x87   : > { %4369 = vmatpush3.bf16.msra.mxu0 %v4813_v34  ;;  %v3865_v34 = vcombine.low %v720_v30, %v736_v33 }
  0x88   : > { %4397 = vmatpush3.bf16.msra.mxu1 %v4814_v35  ;;  %4370 = vmatprep.subr.bf16.mxu0 %v4815_v36  ;;  %v3866_v35 = vcombine.high %v720_v30, %v736_v33  ;;  %v4859_v36 = vld [vmem:[%s5044_s28 + $0x540] sm:$0xff]   ;;  %v4906_v30 = vld [vmem:[%s5044_s28 + $0x6d0] sm:$0xff]  }
  0x89   : > { %4398 = vmatprep.subr.bf16.mxu1 %v4816_v37  ;;  %v4860_v37 = vld [vmem:[%s5044_s28 + $0x5c0] sm:$0xff]   ;;  %v4908_v33 = vld [vmem:[%s5044_s28 + $0x610] sm:$0xff]  }
  0x8b   : > { %4371 = vmatpush3.bf16.msra.mxu0 %v4817_v39  ;;  %v4862_v39 = vld [vmem:[%s5044_s28 + $0x580] sm:$0xff]  }
  0x8c   : > { %4399 = vmatpush3.bf16.msra.mxu1 %v4818_v40  ;;  %4372 = vmatprep.subr.bf16.mxu0 %v4819_v41  ;;  %v4863_v40 = vld [vmem:[%s5044_s28 + $0x548] sm:$0xff]  }
  0x8d   : > { %4400 = vmatprep.subr.bf16.mxu1 %v4820_v42  ;;  %v4864_v41 = vld [vmem:[%s5044_s28 + $0x5c8] sm:$0xff]  }
  0x8e   : > { %v4865_v42 = vld [vmem:[%s5044_s28 + $0x508] sm:$0xff]  }
  0x8f   : > { %4373 = vmatpush3.bf16.msra.mxu0 %v4821_v43  ;;  %v4866_v43 = vld [vmem:[%s5044_s28 + $0x588] sm:$0xff]  }
  0x90   : > { %4401 = vmatpush3.bf16.msra.mxu1 %v4822_v44  ;;  %4414 = vmatprep.subr.bf16.mxu0 %v4823_v53  ;;  %v751_v44 = vld [vmem:[%s5671_s1 + $0x140] sm:$0x77]  ;;  %v4873_v53 = vld [vmem:[%s5044_s28 + $0x590] sm:$0xff]  }
  0x91   : > { %4442 = vmatprep.subr.bf16.mxu1 %v4824_v54  ;;  %v3896_v45 = vcombine.high %v751_v44, %v751_v44  ;;  %v3895_v46 = vcombine.low %v751_v44, %v751_v44  ;;  %v4875_v54 = vld [vmem:[%s5044_s28 + $0x558] sm:$0xff]   ;;  %v4919_v44 = vld [vmem:[%s5044_s28 + $0x668] sm:$0xff]  }
  0x92   : > { %2906 = vmatmul.mubr.bf16.vlgmr.msra.gmra.mrb[24].mxu0 %v3859_v49  ;;  %v752_v49 = vld [vmem:[%s5671_s1 + $0x148] sm:$0x77] }
  0x93   : > { %2954 = vmatmul.mubr.bf16.vlgmr.msra.gmra.mrb[24].mxu1 %v3861_v51  ;;  %4415 = vmatpush3.bf16.msra.mxu0 %v4825_v55  ;;  %v3898_v50 = vcombine.high %v752_v49, %v752_v49  ;;  %v4872_v51 = vld [vmem:[%s5044_s28 + $0x510] sm:$0xff]   ;;  %v3897_v52 = vcombine.low %v752_v49, %v752_v49  ;;  %v4876_v55 = vld [vmem:[%s5044_s28 + $0x5d8] sm:$0xff]  }
  0x94   : > { %4443 = vmatpush3.bf16.msra.mxu1 %v4826_v56  ;;  %4416 = vmatprep.subr.bf16.mxu0 %v4827_v57  ;;  %v4877_v56 = vld [vmem:[%s5044_s28 + $0x518] sm:$0xff]   ;;  %v4924_v49 = vld [vmem:[%s5044_s28 + $0x6f0] sm:$0xff]  }
  0x95   : > { %4444 = vmatprep.subr.bf16.mxu1 %v4828_v58  ;;  %2913 = vmatprep.mubr.bf16.mxu0 %v3892_v62  ;;  %v4878_v57 = vld [vmem:[%s5044_s28 + $0x598] sm:$0xff]   ;;  %v4879_v58 = vld [vmem:[%s5044_s28 + $0x560] sm:$0xff]   ;;  %v4883_v62 = vld [vmem:[%s5044_s28 + $0x568] sm:$0xff]  }
  0x96   : > { %2961 = vmatprep.mubr.bf16.mxu1 %v3894_v3  ;;  %v4888_v3 = vld [vmem:[%s5044_s28 + $0x5f0] sm:$0xff]  }
  0x97   : > { %4417 = vmatpush3.bf16.msra.mxu0 %v4829_v59  ;;  %v4880_v59 = vld [vmem:[%s5044_s28 + $0x5e0] sm:$0xff]  }
  0x98   : > { %4445 = vmatpush3.bf16.msra.mxu1 %v4830_v60  ;;  %4418 = vmatprep.subr.bf16.mxu0 %v4833_v0  ;;  %v4881_v60 = vld [vmem:[%s5044_s28 + $0x520] sm:$0xff]   ;;  %v4885_v0 = vld [vmem:[%s5044_s28 + $0x528] sm:$0xff]  }
  0x99   : > { %4446 = vmatprep.subr.bf16.mxu1 %v4834_v1  ;;  %v4886_v1 = vld [vmem:[%s5044_s28 + $0x5a8] sm:$0xff]  }
  0x9a   : > { %2914 = vmatmul.mubr.bf16.gmra.mrb[28].mxu0 %v3891_v63  ;;  %v4884_v63 = vld [vmem:[%s5044_s28 + $0x5e8] sm:$0xff]  }
  0x9b   : > { %4419 = vmatpush3.bf16.msra.mxu0 %v4836_v4  ;;  %2962 = vmatmul.mubr.bf16.gmra.mrb[28].mxu1 %v3893_v5  ;;  %v4889_v4 = vld [vmem:[%s5044_s28 + $0x530] sm:$0xff]  }
  0x9c   : > { %4447 = vmatpush3.bf16.msra.mxu1 %v4837_v6  ;;  %4420 = vmatprep.subr.bf16.mxu0 %v4839_v7  ;;  %v4890_v5 = vld [vmem:[%s5044_s28 + $0x5b0] sm:$0xff]   ;;  %v4891_v6 = vld [vmem:[%s5044_s28 + $0x578] sm:$0xff]  }
  0x9d   : > { %4448 = vmatprep.subr.bf16.mxu1 %v4840_v8  ;;  %3001 = vmatprep.mubr.bf16.mxu0 %v3864_v32  ;;  %v4892_v7 = vld [vmem:[%s5044_s28 + $0x5f8] sm:$0xff]  }
  0x9e   : > { %3049 = vmatprep.mubr.bf16.mxu1 %v3866_v35  ;;  %v4893_v8 = vld [vmem:[%s5044_s28 + $0x538] sm:$0xff]   ;;  %v4909_v35 = vld [vmem:[%s5044_s28 + $0x690] sm:$0xff]  }
  0x9f   : > { %4421 = vmatpush3.bf16.msra.mxu0 %v4841_v9  ;;  %v4894_v9 = vld [vmem:[%s5044_s28 + $0x5b8] sm:$0xff]  }
  0xa0   : > { %4449 = vmatpush3.bf16.msra.mxu1 %v4842_v10  ;;  %4422 = vmatprep.subr.bf16.mxu0 %v4843_v12  ;;  %v721_v10 = vld [vmem:[%s5671_s1 + $0x50] sm:$0xff]  ;;  %v722_v12 = vld [vmem:[%s5671_s1 + $0x58] sm:$0xff] }
  0xa1   : > { %4450 = vmatprep.subr.bf16.mxu1 %v4844_v13  ;;  %v3867_v13 = vcombine.low %v721_v10, %v737_v11 }
  0xa3   : > { %4423 = vmatpush3.bf16.msra.mxu0 %v4845_v14  ;;  %v3868_v14 = vcombine.high %v721_v10, %v737_v11  ;;  %v4941_v11 = vld [vmem:[%s5044_s28 + $0x750] sm:$0xff]  }
  0xa4   : > { %4451 = vmatpush3.bf16.msra.mxu1 %v4846_v15  ;;  %4424 = vmatprep.subr.bf16.mxu0 %v4847_v16  ;;  %v738_v15 = vld [vmem:[%s5671_s1 + $0xd8] sm:$0xff] }
  0xa5   : > { %4452 = vmatprep.subr.bf16.mxu1 %v4848_v17  ;;  %v3869_v16 = vcombine.low %v722_v12, %v738_v15  ;;  %v3870_v17 = vcombine.high %v722_v12, %v738_v15  ;;  %v4942_v12 = vld [vmem:[%s5044_s28 + $0x7d0] sm:$0xff]  }
  0xa6   : > { %v4944_v15 = vld [vmem:[%s5044_s28 + $0x710] sm:$0xff]  }
  0xa7   : > { %4425 = vmatpush3.bf16.msra.mxu0 %v4849_v18  ;;  %v4895_v18 = vld [vmem:[%s5044_s28 + $0x640] sm:$0xff]  }
  0xa8   : > { %4453 = vmatpush3.bf16.msra.mxu1 %v4850_v19  ;;  %4426 = vmatprep.subr.bf16.mxu0 %v4851_v20  ;;  %v4896_v19 = vld [vmem:[%s5044_s28 + $0x6c0] sm:$0xff]  }
  0xa9   : > { %4454 = vmatprep.subr.bf16.mxu1 %v4852_v21  ;;  %v4897_v20 = vld [vmem:[%s5044_s28 + $0x600] sm:$0xff]  }
  0xaa   : > { %v4898_v21 = vld [vmem:[%s5044_s28 + $0x680] sm:$0xff]  }
  0xab   : > { %4427 = vmatpush3.bf16.msra.mxu0 %v4853_v22  ;;  %v4899_v22 = vld [vmem:[%s5044_s28 + $0x648] sm:$0xff]  }
  0xac   : > { %4455 = vmatpush3.bf16.msra.mxu1 %v4854_v23  ;;  %4428 = vmatprep.subr.bf16.mxu0 %v4855_v24  ;;  %v4900_v23 = vld [vmem:[%s5044_s28 + $0x6c8] sm:$0xff]  }
  0xad   : > { %4456 = vmatprep.subr.bf16.mxu1 %v4856_v25  ;;  %v4901_v24 = vld [vmem:[%s5044_s28 + $0x608] sm:$0xff]  }
  0xae   : > { %v4902_v25 = vld [vmem:[%s5044_s28 + $0x688] sm:$0xff]  }
  0xaf   : > { %4429 = vmatpush3.bf16.msra.mxu0 %v4857_v26  ;;  %v753_v26 = vld [vmem:[%s5671_s1 + $0x150] sm:$0x77] }
  0xb0   : > { %4457 = vmatpush3.bf16.msra.mxu1 %v4858_v27  ;;  %4470 = vmatprep.subr.bf16.mxu0 %v4859_v36  ;;  %v3900_v27 = vcombine.high %v753_v26, %v753_v26  ;;  %v3899_v28 = vcombine.low %v753_v26, %v753_v26  ;;  %v4911_v36 = vld [vmem:[%s5044_s28 + $0x658] sm:$0xff]   ;;  %v4951_v26 = vld [vmem:[%s5044_s28 + $0x760] sm:$0xff]  }
  0xb1   : > { %4498 = vmatprep.subr.bf16.mxu1 %v4860_v37  ;;  %v4912_v37 = vld [vmem:[%s5044_s28 + $0x6d8] sm:$0xff]  }
  0xb2   : > { %3002 = vmatmul.mubr.bf16.vlgmr.msra.gmra.mrb[32].mxu0 %v3863_v31  ;;  %v754_v31 = vld [vmem:[%s5671_s1 + $0x158] sm:$0x77] }
  0xb3   : > { %3050 = vmatmul.mubr.bf16.vlgmr.msra.gmra.mrb[32].mxu1 %v3865_v34  ;;  %4471 = vmatpush3.bf16.msra.mxu0 %v4861_v38  ;;  %v3902_v32 = vcombine.high %v754_v31, %v754_v31  ;;  %v3901_v34 = vcombine.low %v754_v31, %v754_v31  ;;  %v4913_v38 = vld [vmem:[%s5044_s28 + $0x618] sm:$0xff]  }
  0xb4   : > { %4499 = vmatpush3.bf16.msra.mxu1 %v4862_v39  ;;  %4472 = vmatprep.subr.bf16.mxu0 %v4863_v40  ;;  %v4914_v39 = vld [vmem:[%s5044_s28 + $0x698] sm:$0xff]   ;;  %v4915_v40 = vld [vmem:[%s5044_s28 + $0x660] sm:$0xff]  }
  0xb5   : > { %4500 = vmatprep.subr.bf16.mxu1 %v4864_v41  ;;  %3009 = vmatprep.mubr.bf16.mxu0 %v3896_v45  ;;  %v4916_v41 = vld [vmem:[%s5044_s28 + $0x6e0] sm:$0xff]   ;;  %v4920_v45 = vld [vmem:[%s5044_s28 + $0x6e8] sm:$0xff]  }
  0xb6   : > { %3057 = vmatprep.mubr.bf16.mxu1 %v3898_v50  ;;  %v4925_v50 = vld [vmem:[%s5044_s28 + $0x630] sm:$0xff]  }
  0xb7   : > { %4473 = vmatpush3.bf16.msra.mxu0 %v4865_v42  ;;  %v4917_v42 = vld [vmem:[%s5044_s28 + $0x620] sm:$0xff]  }
  0xb8   : > { %4501 = vmatpush3.bf16.msra.mxu1 %v4866_v43  ;;  %4474 = vmatprep.subr.bf16.mxu0 %v4869_v47  ;;  %v4918_v43 = vld [vmem:[%s5044_s28 + $0x6a0] sm:$0xff]   ;;  %v4922_v47 = vld [vmem:[%s5044_s28 + $0x6a8] sm:$0xff]  }
  0xb9   : > { %4502 = vmatprep.subr.bf16.mxu1 %v4870_v48  ;;  %v4923_v48 = vld [vmem:[%s5044_s28 + $0x670] sm:$0xff]  }
  0xba   : > { %3010 = vmatmul.mubr.bf16.gmra.mrb[36].mxu0 %v3895_v46  ;;  %v4921_v46 = vld [vmem:[%s5044_s28 + $0x628] sm:$0xff]  }
  0xbb   : > { %4475 = vmatpush3.bf16.msra.mxu0 %v4872_v51  ;;  %3058 = vmatmul.mubr.bf16.gmra.mrb[36].mxu1 %v3897_v52  ;;  %v4926_v51 = vld [vmem:[%s5044_s28 + $0x6b0] sm:$0xff]   ;;  %v4927_v52 = vld [vmem:[%s5044_s28 + $0x678] sm:$0xff]  }
  0xbc   : > { %4503 = vmatpush3.bf16.msra.mxu1 %v4873_v53  ;;  %4476 = vmatprep.subr.bf16.mxu0 %v4875_v54  ;;  %v4928_v53 = vld [vmem:[%s5044_s28 + $0x6f8] sm:$0xff]  }
  0xbd   : > { %4504 = vmatprep.subr.bf16.mxu1 %v4876_v55  ;;  %3097 = vmatprep.mubr.bf16.mxu0 %v3868_v14  ;;  %v4929_v54 = vld [vmem:[%s5044_s28 + $0x638] sm:$0xff]  }
  0xbe   : > { %3145 = vmatprep.mubr.bf16.mxu1 %v3870_v17  ;;  %v4930_v55 = vld [vmem:[%s5044_s28 + $0x6b8] sm:$0xff]   ;;  %v4945_v17 = vld [vmem:[%s5044_s28 + $0x790] sm:$0xff]  }
  0xbf   : > { %4477 = vmatpush3.bf16.msra.mxu0 %v4877_v56  ;;  %v723_v56 = vld [vmem:[%s5671_s1 + $0x60] sm:$0xff] }
  0xc0   : > { %4505 = vmatpush3.bf16.msra.mxu1 %v4878_v57  ;;  %4478 = vmatprep.subr.bf16.mxu0 %v4879_v58  ;;  %v739_v57 = vld [vmem:[%s5671_s1 + $0xe0] sm:$0xff]  ;;  %v724_v58 = vld [vmem:[%s5671_s1 + $0x68] sm:$0xff] }
  0xc1   : > { %4506 = vmatprep.subr.bf16.mxu1 %v4880_v59  ;;  %v3871_v59 = vcombine.low %v723_v56, %v739_v57 }
  0xc3   : > { %4479 = vmatpush3.bf16.msra.mxu0 %v4881_v60  ;;  %v3872_v60 = vcombine.high %v723_v56, %v739_v57  ;;  %v4961_v56 = vld [vmem:[%s5044_s28 + $0x730] sm:$0xff]  }
  0xc4   : > { %4507 = vmatpush3.bf16.msra.mxu1 %v4882_v61  ;;  %4480 = vmatprep.subr.bf16.mxu0 %v4883_v62  ;;  %v740_v61 = vld [vmem:[%s5671_s1 + $0xe8] sm:$0xff] }
  0xc5   : > { %4508 = vmatprep.subr.bf16.mxu1 %v4884_v63  ;;  %v3873_v62 = vcombine.low %v724_v58, %v740_v61  ;;  %v3874_v63 = vcombine.high %v724_v58, %v740_v61  ;;  %v4962_v58 = vld [vmem:[%s5044_s28 + $0x7b0] sm:$0xff]   ;;  %v4963_v61 = vld [vmem:[%s5044_s28 + $0x778] sm:$0xff]  }
  0xc7   : > { %4481 = vmatpush3.bf16.msra.mxu0 %v4885_v0  ;;  %v4931_v0 = vld [vmem:[%s5044_s28 + $0x740] sm:$0xff]  }
  0xc8   : > { %4509 = vmatpush3.bf16.msra.mxu1 %v4886_v1  ;;  %4482 = vmatprep.subr.bf16.mxu0 %v4887_v2  ;;  %v4932_v1 = vld [vmem:[%s5044_s28 + $0x7c0] sm:$0xff]  }
  0xc9   : > { %4510 = vmatprep.subr.bf16.mxu1 %v4888_v3  ;;  %v4933_v2 = vld [vmem:[%s5044_s28 + $0x700] sm:$0xff]  }
  0xca   : > { %v4934_v3 = vld [vmem:[%s5044_s28 + $0x780] sm:$0xff]  }
  0xcb   : > { %4483 = vmatpush3.bf16.msra.mxu0 %v4889_v4  ;;  %v4935_v4 = vld [vmem:[%s5044_s28 + $0x748] sm:$0xff]  }
  0xcc   : > { %4511 = vmatpush3.bf16.msra.mxu1 %v4890_v5  ;;  %4484 = vmatprep.subr.bf16.mxu0 %v4891_v6  ;;  %v4936_v5 = vld [vmem:[%s5044_s28 + $0x7c8] sm:$0xff]  }
  0xcd   : > { %4512 = vmatprep.subr.bf16.mxu1 %v4892_v7  ;;  %v4937_v6 = vld [vmem:[%s5044_s28 + $0x708] sm:$0xff]  }
  0xce   : > { %v4938_v7 = vld [vmem:[%s5044_s28 + $0x788] sm:$0xff]  }
  0xcf   : > { %4485 = vmatpush3.bf16.msra.mxu0 %v4893_v8  ;;  %v755_v8 = vld [vmem:[%s5671_s1 + $0x160] sm:$0x77] }
  0xd0   : > { %4513 = vmatpush3.bf16.msra.mxu1 %v4894_v9  ;;  %4526 = vmatprep.subr.bf16.mxu0 %v4895_v18  ;;  %v3904_v9 = vcombine.high %v755_v8, %v755_v8  ;;  %v3903_v10 = vcombine.low %v755_v8, %v755_v8  ;;  %v4947_v18 = vld [vmem:[%s5044_s28 + $0x758] sm:$0xff]   ;;  %v757_v8 = vld [vmem:[%s5671_s1 + $0x170] sm:$0x77] }
  0xd1   : > { %4554 = vmatprep.subr.bf16.mxu1 %v4896_v19  ;;  %v4948_v19 = vld [vmem:[%s5044_s28 + $0x7d8] sm:$0xff]  }
  0xd2   : > { %3098 = vmatmul.mubr.bf16.vlgmr.msra.gmra.mrb[40].mxu0 %v3867_v13  ;;  %v756_v13 = vld [vmem:[%s5671_s1 + $0x168] sm:$0x77] }
  0xd3   : > { %3146 = vmatmul.mubr.bf16.vlgmr.msra.gmra.mrb[40].mxu1 %v3869_v16  ;;  %4527 = vmatpush3.bf16.msra.mxu0 %v4897_v20  ;;  %v3906_v14 = vcombine.high %v756_v13, %v756_v13  ;;  %v3905_v16 = vcombine.low %v756_v13, %v756_v13 }
  0xd4   : > { %4555 = vmatpush3.bf16.msra.mxu1 %v4898_v21  ;;  %4528 = vmatprep.subr.bf16.mxu0 %v4899_v22  ;;  %v765_v21 = vpop.permute.xlu0 %764  ;;  %v4949_v22 = vld [vmem:[%s5044_s28 + $0x718] sm:$0xff]  }
  0xd5   : > { %4556 = vmatprep.subr.bf16.mxu1 %v4900_v23  ;;  %3105 = vmatprep.mubr.bf16.mxu0 %v3900_v27 }
  0xd6   : > { %3153 = vmatprep.mubr.bf16.mxu1 %v3902_v32  ;;  %v4953_v32 = vld [vmem:[%s5044_s28 + $0x720] sm:$0xff]  }
  0xd7   : > { %4529 = vmatpush3.bf16.msra.mxu0 %v4901_v24  ;;  %v4950_v24 = vld [vmem:[%s5044_s28 + $0x798] sm:$0xff]  }
  0xd8   : > { %4557 = vmatpush3.bf16.msra.mxu1 %v4902_v25  ;;  %4530 = vmatprep.subr.bf16.mxu0 %v4905_v29  ;;  %v4952_v29 = vld [vmem:[%s5044_s28 + $0x7e0] sm:$0xff]  }
  0xd9   : > { %4558 = vmatprep.subr.bf16.mxu1 %v4906_v30 }
  0xda   : > { %3106 = vmatmul.mubr.bf16.gmra.mrb[44].mxu0 %v3899_v28 }
  0xdb   : > { %4531 = vmatpush3.bf16.msra.mxu0 %v4908_v33  ;;  %3154 = vmatmul.mubr.bf16.gmra.mrb[44].mxu1 %v3901_v34 }
  0xdc   : > { %4559 = vmatpush3.bf16.msra.mxu1 %v4909_v35  ;;  %4532 = vmatprep.subr.bf16.mxu0 %v4911_v36  ;;  %v4954_v35 = vld [vmem:[%s5044_s28 + $0x7a0] sm:$0xff]  }
  0xdd   : > { %4560 = vmatprep.subr.bf16.mxu1 %v4912_v37  ;;  %3193 = vmatprep.mubr.bf16.mxu0 %v3872_v60  ;;  %v770_v37 = vpop.permute.xlu0 %769 }
  0xde   : > { %3241 = vmatprep.mubr.bf16.mxu1 %v3874_v63  ;;  %v4964_v63 = vld [vmem:[%s5044_s28 + $0x7f8] sm:$0xff]  }
  0xdf   : > { %4533 = vmatpush3.bf16.msra.mxu0 %v4913_v38 }
  0xe0   : > { %4561 = vmatpush3.bf16.msra.mxu1 %v4914_v39  ;;  %4534 = vmatprep.subr.bf16.mxu0 %v4915_v40  ;;  %v4955_v39 = vld [vmem:[%s5044_s28 + $0x768] sm:$0xff]  }
  0xe1   : > { %4562 = vmatprep.subr.bf16.mxu1 %v4916_v41 }
  0xe3   : > { %4535 = vmatpush3.bf16.msra.mxu0 %v4917_v42  ;;  %v4956_v42 = vld [vmem:[%s5044_s28 + $0x7e8] sm:$0xff]  }
  0xe4   : > { %4563 = vmatpush3.bf16.msra.mxu1 %v4918_v43  ;;  %4536 = vmatprep.subr.bf16.mxu0 %v4919_v44 }
  0xe5   : > { %4564 = vmatprep.subr.bf16.mxu1 %v4920_v45  ;;  %v4957_v45 = vld [vmem:[%s5044_s28 + $0x728] sm:$0xff]  }
  0xe7   : > { %4537 = vmatpush3.bf16.msra.mxu0 %v4921_v46 }
  0xe8   : > { %4565 = vmatpush3.bf16.msra.mxu1 %v4922_v47  ;;  %4538 = vmatprep.subr.bf16.mxu0 %v4923_v48  ;;  %v4958_v48 = vld [vmem:[%s5044_s28 + $0x7a8] sm:$0xff]  }
  0xe9   : > { %4566 = vmatprep.subr.bf16.mxu1 %v4924_v49 }
  0xeb   : > { %4539 = vmatpush3.bf16.msra.mxu0 %v4925_v50 }
  0xec   : > { %4567 = vmatpush3.bf16.msra.mxu1 %v4926_v51  ;;  %4540 = vmatprep.subr.bf16.mxu0 %v4927_v52  ;;  %v4959_v52 = vld [vmem:[%s5044_s28 + $0x770] sm:$0xff]  }
  0xed   : > { %4568 = vmatprep.subr.bf16.mxu1 %v4928_v53 }
  0xef   : > { %4541 = vmatpush3.bf16.msra.mxu0 %v4929_v54  ;;  %v4960_v54 = vld [vmem:[%s5044_s28 + $0x7f0] sm:$0xff]  }
  0xf0   : > { %4569 = vmatpush3.bf16.msra.mxu1 %v4930_v55  ;;  %4582 = vmatprep.subr.bf16.mxu0 %v4931_v0  ;;  %v4965_v0 = vld [vmem:[%s5044_s28 + $0x738] sm:$0xff]  }
  0xf1   : > { %4610 = vmatprep.subr.bf16.mxu1 %v4932_v1  ;;  %v4966_v1 = vld [vmem:[%s5044_s28 + $0x7b8] sm:$0xff]  }
  0xf2   : > { %3194 = vmatmul.mubr.bf16.vlgmr.msra.gmra.mrb[48].mxu0 %v3871_v59 }
  0xf3   : > { %3242 = vmatmul.mubr.bf16.vlgmr.msra.gmra.mrb[48].mxu1 %v3873_v62  ;;  %4583 = vmatpush3.bf16.msra.mxu0 %v4933_v2  ;;  %v725_v2 = vld [vmem:[%s5671_s1 + $0x70] sm:$0xff] }
  0xf4   : > { %4611 = vmatpush3.bf16.msra.mxu1 %v4934_v3  ;;  %4584 = vmatprep.subr.bf16.mxu0 %v4935_v4  ;;  %v741_v3 = vld [vmem:[%s5671_s1 + $0xf0] sm:$0xff]  ;;  %v726_v4 = vld [vmem:[%s5671_s1 + $0x78] sm:$0xff] }
  0xf5   : > { %4612 = vmatprep.subr.bf16.mxu1 %v4936_v5  ;;  %3201 = vmatprep.mubr.bf16.mxu0 %v3904_v9  ;;  %v3875_v5 = vcombine.low %v725_v2, %v741_v3  ;;  %v758_v9 = vld [vmem:[%s5671_s1 + $0x178] sm:$0x77] }
  0xf6   : > { %3249 = vmatprep.mubr.bf16.mxu1 %v3906_v14  ;;  %v3910_v13 = vcombine.high %v758_v9, %v758_v9  ;;  %v3907_v14 = vcombine.low %v757_v8, %v757_v8 }
  0xf7   : > { %4585 = vmatpush3.bf16.msra.mxu0 %v4937_v6  ;;  %v3876_v6 = vcombine.high %v725_v2, %v741_v3 }
  0xf8   : > { %4613 = vmatpush3.bf16.msra.mxu1 %v4938_v7  ;;  %4586 = vmatprep.subr.bf16.mxu0 %v4941_v11  ;;  %v742_v7 = vld [vmem:[%s5671_s1 + $0xf8] sm:$0xff] }
  0xf9   : > { %4614 = vmatprep.subr.bf16.mxu1 %v4942_v12  ;;  %v3878_v11 = vcombine.high %v726_v4, %v742_v7  ;;  %v3908_v12 = vcombine.high %v757_v8, %v757_v8 }
  0xfa   : > { %3202 = vmatmul.mubr.bf16.gmra.mrb[52].mxu0 %v3903_v10  ;;  %v3877_v10 = vcombine.low %v726_v4, %v742_v7 }
  0xfb   : > { %4587 = vmatpush3.bf16.msra.mxu0 %v4944_v15  ;;  %3250 = vmatmul.mubr.bf16.gmra.mrb[52].mxu1 %v3905_v16  ;;  %v3909_v15 = vcombine.low %v758_v9, %v758_v9  ;;  %v775_v16 = vpop.permute.xlu1 %774 }
  0xfc   : > { %4615 = vmatpush3.bf16.msra.mxu1 %v4945_v17  ;;  %4588 = vmatprep.subr.bf16.mxu0 %v4947_v18 }
  0xfd   : > { %4616 = vmatprep.subr.bf16.mxu1 %v4948_v19  ;;  %3289 = vmatprep.mubr.bf16.mxu0 %v3876_v6 }
  0xfe   : > { %3337 = vmatprep.mubr.bf16.mxu1 %v3878_v11  ;;  %v3354_v11 = vld [vmem:[%s5673_s3 + $0x8] sm:$0xff] }
  0xff   : > { %4589 = vmatpush3.bf16.msra.mxu0 %v4949_v22 }
 0x100   : > { %4617 = vmatpush3.bf16.msra.mxu1 %v4950_v24  ;;  %4590 = vmatprep.subr.bf16.mxu0 %v4951_v26 }
 0x101   : > { %4618 = vmatprep.subr.bf16.mxu1 %v4952_v29 }
 0x103   : > { %4591 = vmatpush3.bf16.msra.mxu0 %v4953_v32 }
 0x104   : > { %4619 = vmatpush3.bf16.msra.mxu1 %v4954_v35  ;;  %4592 = vmatprep.subr.bf16.mxu0 %v4955_v39 }
 0x105   : > { %v4206_v20 = vpop.f32.mrb[0].mxu0  ;;  %4620 = vmatprep.subr.bf16.mxu1 %v4956_v42 }
 0x106   : > { %v4234_v23 = vpop.f32.mrb[0].mxu1  ;;  %v4207_v25 = vpop.f32.mrb[1].mxu0 }
 0x107   : > { %v4208_v27 = vadd.f32 %v4207_v25, %v4206_v20  ;;  %v4235_v28 = vpop.f32.mrb[1].mxu1  ;;  %v4209_v31 = vpop.f32.mrb[2].mxu0  ;;  %4593 = vmatpush3.bf16.msra.mxu0 %v4957_v45 }
 0x108   : > { %v4236_v30 = vadd.f32 %v4235_v28, %v4234_v23  ;;  %v4237_v34 = vpop.f32.mrb[2].mxu1  ;;  %v4210_v36 = vpop.f32.mrb[3].mxu0  ;;  %4621 = vmatpush3.bf16.msra.mxu1 %v4958_v48  ;;  %4594 = vmatprep.subr.bf16.mxu0 %v4959_v52 }
 0x109   : > { %v2620_v33 = vadd.f32 %v4208_v27, %v765_v21  ;;  %v4211_v40 = vadd.f32 %v4210_v36, %v4209_v31  ;;  %v4238_v41 = vpop.f32.mrb[3].mxu1  ;;  %4622 = vmatprep.subr.bf16.mxu1 %v4960_v54 }
 0x10a   : > { %v4239_v43 = vadd.f32 %v4238_v41, %v4237_v34 }
 0x10b   : > { %v5449_v38 = vadd.f32 %v4236_v30, %v2620_v33  ;;  %v2623_v46 = vadd.f32 %v4211_v40, %v770_v37  ;;  %4595 = vmatpush3.bf16.msra.mxu0 %v4961_v56 }
 0x10c   : > { %4623 = vmatpush3.bf16.msra.mxu1 %v4962_v58  ;;  %4596 = vmatprep.subr.bf16.mxu0 %v4963_v61 }
 0x10d   : > { %v4212_v44 = vpop.f32.mrb[4].mxu0  ;;  %v5455_v51 = vadd.f32 %v4239_v43, %v2623_v46  ;;  %4624 = vmatprep.subr.bf16.mxu1 %v4964_v63 }
 0x10e   : > { %v4213_v47 = vpop.f32.mrb[5].mxu0  ;;  %v4240_v53 = vpop.f32.mrb[4].mxu1 }
 0x10f   : > { %v4214_v49 = vadd.f32 %v4213_v47, %v4212_v44  ;;  %v4215_v50 = vpop.f32.mrb[6].mxu0  ;;  %v4241_v57 = vpop.f32.mrb[5].mxu1  ;;  %4597 = vmatpush3.bf16.msra.mxu0 %v4965_v0 }
 0x110   : > { %v4216_v55 = vpop.f32.mrb[7].mxu0  ;;  %v4242_v59 = vadd.f32 %v4241_v57, %v4240_v53  ;;  %v4243_v60 = vpop.f32.mrb[6].mxu1  ;;  %4625 = vmatpush3.bf16.msra.mxu1 %v4966_v1 }
 0x111   : > { %v4244_v62 = vpop.f32.mrb[7].mxu1  ;;  %v2628_v17 = vadd.f32 %v4214_v49, %v775_v16  ;;  %v3353_v16 = vld [vmem:[%s5673_s3] sm:$0xff] }
 0x112   : > { %3290 = vmatmul.mubr.bf16.vlgmr.msra.gmra.mrb[56].mxu0 %v3875_v5 }
 0x113   : > { %3338 = vmatmul.mubr.bf16.vlgmr.msra.gmra.mrb[56].mxu1 %v3877_v10  ;;  %3297 = vmatprep.mubr.bf16.mxu0 %v3908_v12  ;;  %v2676_v18 = vadd.f32 %v4242_v59, %v2628_v17  ;;  %v3362_v12 = vld [vmem:[%s5673_s3 + $0x48] sm:$0xff]  ;;  %v3361_v17 = vld [vmem:[%s5673_s3 + $0x40] sm:$0xff] }
 0x114   : > { %3345 = vmatprep.mubr.bf16.mxu1 %v3910_v13  ;;  %v3356_v13 = vld [vmem:[%s5673_s3 + $0x18] sm:$0xff] }
 0x11a   : > { %3298 = vmatmul.mubr.bf16.gmra.mrb[60].mxu0 %v3907_v14  ;;  %v4638_v14 = vpack.c.bf16 %v3362_v12, %v3354_v11 }
 0x11b   : > { %3346 = vmatmul.mubr.bf16.gmra.mrb[60].mxu1 %v3909_v15  ;;  %v3364_v15 = vld [vmem:[%s5673_s3 + $0x58] sm:$0xff] }
 0x11c   : > { %4639 = vmatprep.subr.bf16.mxu0 %v4638_v14 }
 0x125   : > { %v4262_v19 = vpop.f32.mrb[8].mxu0 }
 0x126   : > { %v4290_v20 = vpop.f32.mrb[8].mxu1  ;;  %v4263_v21 = vpop.f32.mrb[9].mxu0 }
 0x127   : > { %v4264_v22 = vadd.f32 %v4263_v21, %v4262_v19  ;;  %v4291_v23 = vpop.f32.mrb[9].mxu1  ;;  %v4265_v24 = vpop.f32.mrb[10].mxu0  ;;  %v4640_v19 = vpack.c.bf16 %v3361_v17, %v3353_v16  ;;  %v3363_v21 = vld [vmem:[%s5673_s3 + $0x50] sm:$0xff] }
 0x128   : > { %v4292_v25 = vadd.f32 %v4291_v23, %v4290_v20  ;;  %v4293_v26 = vpop.f32.mrb[10].mxu1  ;;  %v4266_v27 = vpop.f32.mrb[11].mxu0  ;;  %v3355_v20 = vld [vmem:[%s5673_s3 + $0x10] sm:$0xff] }
 0x129   : > { %v2716_v28 = vadd.f32 %v4264_v22, %v5449_v38  ;;  %v4267_v29 = vadd.f32 %v4266_v27, %v4265_v24  ;;  %v4294_v30 = vpop.f32.mrb[11].mxu1  ;;  %v3370_v22 = vld [vmem:[%s5673_s3 + $0x88] sm:$0xff]  ;;  %v4648_v23 = vpack.c.bf16 %v3363_v21, %v3355_v20  ;;  %4641 = vmatpush1.bf16.msra.mxu0 %v4640_v19 }
 0x12a   : > { %v4295_v31 = vadd.f32 %v4294_v30, %v4293_v26  ;;  %v3378_v24 = vld [vmem:[%s5673_s3 + $0xc8] sm:$0xff]  ;;  %v3380_v26 = vld [vmem:[%s5673_s3 + $0xd8] sm:$0xff]  ;;  %v3377_v30 = vld [vmem:[%s5673_s3 + $0xc0] sm:$0xff] }
 0x12b   : > { %v2764_v32 = vadd.f32 %v4292_v25, %v2716_v28  ;;  %v2719_v33 = vadd.f32 %v4267_v29, %v5455_v51  ;;  %v3372_v25 = vld [vmem:[%s5673_s3 + $0x98] sm:$0xff]  ;;  %v4642_v27 = vpack.c.bf16 %v3378_v24, %v3370_v22  ;;  %v3369_v29 = vld [vmem:[%s5673_s3 + $0x80] sm:$0xff] }
 0x12c   : > { %v4650_v28 = vpack.c.bf16 %v3380_v26, %v3372_v25 }
 0x12d   : > { %v2767_v34 = vadd.f32 %v4295_v31, %v2719_v33  ;;  %v4268_v35 = vpop.f32.mrb[12].mxu0  ;;  %v3371_v31 = vld [vmem:[%s5673_s3 + $0x90] sm:$0xff]  ;;  %4643 = vmatprep.subr.bf16.mxu0 %v4642_v27 }
 0x12e   : > { %v4269_v36 = vpop.f32.mrb[13].mxu0  ;;  %v4296_v37 = vpop.f32.mrb[12].mxu1  ;;  %v3379_v33 = vld [vmem:[%s5673_s3 + $0xd0] sm:$0xff] }
 0x12f   : > { %v4270_v39 = vadd.f32 %v4269_v36, %v4268_v35  ;;  %v4297_v40 = vpop.f32.mrb[13].mxu1  ;;  %v4271_v41 = vpop.f32.mrb[14].mxu0 }
 0x130   : > { %v4298_v42 = vadd.f32 %v4297_v40, %v4296_v37  ;;  %v4272_v43 = vpop.f32.mrb[15].mxu0  ;;  %v4299_v44 = vpop.f32.mrb[14].mxu1 }
 0x131   : > { %v2724_v45 = vadd.f32 %v4270_v39, %v2676_v18  ;;  %v4300_v46 = vpop.f32.mrb[15].mxu1  ;;  %v4646_v18 = vpack.c.bf16 %v3364_v15, %v3356_v13 }
 0x133   : > { %v2772_v47 = vadd.f32 %v4298_v42, %v2724_v45  ;;  %4647 = vmatprep.subr.bf16.mxu1 %v4646_v18 }
 0x134   : > { %4649 = vmatpush1.bf16.msra.mxu1 %v4648_v23 }
 0x135   : > { %4651 = vmatprep.subr.bf16.mxu1 %v4650_v28 }
 0x145   : > { %v4318_v38 = vpop.f32.mrb[16].mxu0 }
 0x146   : > { %v4346_v48 = vpop.f32.mrb[16].mxu1  ;;  %v4319_v49 = vpop.f32.mrb[17].mxu0 }
 0x147   : > { %v4320_v50 = vadd.f32 %v4319_v49, %v4318_v38  ;;  %v4347_v52 = vpop.f32.mrb[17].mxu1  ;;  %v4321_v53 = vpop.f32.mrb[18].mxu0 }
 0x148   : > { %v4348_v51 = vadd.f32 %v4347_v52, %v4346_v48  ;;  %v4349_v54 = vpop.f32.mrb[18].mxu1  ;;  %v4322_v55 = vpop.f32.mrb[19].mxu0 }
 0x149   : > { %v2812_v56 = vadd.f32 %v4320_v50, %v2764_v32  ;;  %v4323_v57 = vadd.f32 %v4322_v55, %v4321_v53  ;;  %v4350_v58 = vpop.f32.mrb[19].mxu1  ;;  %v4644_v32 = vpack.c.bf16 %v3377_v30, %v3369_v29 }
 0x14a   : > { %v4351_v59 = vadd.f32 %v4350_v58, %v4349_v54 }
 0x14b   : > { %v2860_v60 = vadd.f32 %v4348_v51, %v2812_v56  ;;  %v2815_v61 = vadd.f32 %v4323_v57, %v2767_v34  ;;  %v4652_v34 = vpack.c.bf16 %v3379_v33, %v3371_v31  ;;  %4645 = vmatpush1.bf16.msra.mxu0 %v4644_v32 }
 0x14d   : > { %v2863_v62 = vadd.f32 %v4351_v59, %v2815_v61  ;;  %v4324_v63 = vpop.f32.mrb[20].mxu0  ;;  %4653 = vmatpush1.bf16.msra.mxu1 %v4652_v34 }
 0x14e   : > { %v4325_v0 = vpop.f32.mrb[21].mxu0  ;;  %v4352_v1 = vpop.f32.mrb[20].mxu1 }
 0x14f   : > { %v4326_v2 = vadd.f32 %v4325_v0, %v4324_v63  ;;  %v4353_v3 = vpop.f32.mrb[21].mxu1  ;;  %v4327_v4 = vpop.f32.mrb[22].mxu0  ;;  %v3386_v63 = vld [vmem:[%s5673_s3 + $0x108] sm:$0xf]  ;;  %v3385_v0 = vld [vmem:[%s5673_s3 + $0x100] sm:$0xf] }
 0x150   : > { %v4354_v5 = vadd.f32 %v4353_v3, %v4352_v1  ;;  %v4328_v6 = vpop.f32.mrb[23].mxu0  ;;  %v4355_v7 = vpop.f32.mrb[22].mxu1  ;;  %4167 = vmatprep.subr.msk.mxu0 %vm3403_vm0, %v3386_v63  ;;  %v3387_v1 = vld [vmem:[%s5673_s3 + $0x110] sm:$0xf]  ;;  %v3358_v3 = vld [vmem:[%s5673_s3 + $0x28] sm:$0xff] }
 0x151   : > { %v2820_v8 = vadd.f32 %v4326_v2, %v2772_v47  ;;  %v4356_v9 = vpop.f32.mrb[23].mxu1  ;;  %4168 = vmatpush1.msk.msra.mxu0 %vm3403_vm0, %v3385_v0  ;;  %v3366_v4 = vld [vmem:[%s5673_s3 + $0x68] sm:$0xff]  ;;  %v4980_v6 = vmov 0.0  }
 0x152   : > { %3492 = vmatprep.mubr.f32.mxu0 %v4980_v6  ;;  %3575 = vmatprep.mubr.f32.mxu1 %v4980_v6  ;;  %v4654_v7 = vpack.c.bf16 %v3366_v4, %v3358_v3 }
 0x153   : > { %v2868_v10 = vadd.f32 %v4354_v5, %v2820_v8  ;;  %v3360_v5 = vld [vmem:[%s5673_s3 + $0x38] sm:$0xff] }
 0x154   : > { %v3368_v8 = vld [vmem:[%s5673_s3 + $0x78] sm:$0xff]  ;;  %4655 = vmatprep.subr.bf16.mxu0 %v4654_v7 }
 0x155   : > { %v4662_v9 = vpack.c.bf16 %v3368_v8, %v3360_v5 }
 0x165   : > { %v4374_v35 = vpop.f32.mrb[24].mxu0 }
 0x166   : > { %v4402_v36 = vpop.f32.mrb[24].mxu1  ;;  %v4375_v37 = vpop.f32.mrb[25].mxu0 }
 0x167   : > { %v4403_v39 = vpop.f32.mrb[25].mxu1  ;;  %v4376_v40 = vadd.f32 %v4375_v37, %v4374_v35  ;;  %v4377_v42 = vpop.f32.mrb[26].mxu0 }
 0x168   : > { %v4404_v41 = vadd.f32 %v4403_v39, %v4402_v36  ;;  %v4405_v43 = vpop.f32.mrb[26].mxu1  ;;  %v4378_v44 = vpop.f32.mrb[27].mxu0 }
 0x169   : > { %v4406_v45 = vpop.f32.mrb[27].mxu1  ;;  %v2908_v46 = vadd.f32 %v4376_v40, %v2860_v60  ;;  %v4379_v47 = vadd.f32 %v4378_v44, %v4377_v42  ;;  %v3388_v60 = vld [vmem:[%s5673_s3 + $0x118] sm:$0xf] }
 0x16a   : > { %v4407_v38 = vadd.f32 %v4406_v45, %v4405_v43  ;;  %4172 = vmatprep.subr.msk.mxu1 %vm3403_vm0, %v3388_v60 }
 0x16b   : > { %v2956_v48 = vadd.f32 %v4404_v41, %v2908_v46  ;;  %v2911_v49 = vadd.f32 %v4379_v47, %v2863_v62  ;;  %4173 = vmatpush1.msk.msra.mxu1 %vm3403_vm0, %v3387_v1 }
 0x16c   : > { %4663 = vmatprep.subr.bf16.mxu1 %v4662_v9 }
 0x16d   : > { %v2959_v50 = vadd.f32 %v4407_v38, %v2911_v49  ;;  %v4380_v52 = vpop.f32.mrb[28].mxu0 }
 0x16e   : > { %v4381_v53 = vpop.f32.mrb[29].mxu0  ;;  %v4408_v55 = vpop.f32.mrb[28].mxu1 }
 0x16f   : > { %v4382_v51 = vadd.f32 %v4381_v53, %v4380_v52  ;;  %v4383_v54 = vpop.f32.mrb[30].mxu0  ;;  %v4409_v58 = vpop.f32.mrb[29].mxu1 }
 0x170   : > { %v4384_v56 = vpop.f32.mrb[31].mxu0  ;;  %v4410_v59 = vadd.f32 %v4409_v58, %v4408_v55  ;;  %v4411_v61 = vpop.f32.mrb[30].mxu1 }
 0x171   : > { %v2916_v57 = vadd.f32 %v4382_v51, %v2868_v10  ;;  %v4412_v62 = vpop.f32.mrb[31].mxu1 }
 0x173   : > { %v2964_v2 = vadd.f32 %v4410_v59, %v2916_v57 }
 0x185   : > { %v4430_v10 = vpop.f32.mrb[32].mxu0 }
 0x186   : > { %v4458_v11 = vpop.f32.mrb[32].mxu1  ;;  %v4431_v12 = vpop.f32.mrb[33].mxu0 }
 0x187   : > { %v4432_v13 = vadd.f32 %v4431_v12, %v4430_v10  ;;  %v4459_v14 = vpop.f32.mrb[33].mxu1  ;;  %v4433_v15 = vpop.f32.mrb[34].mxu0 }
 0x188   : > { %v4460_v16 = vadd.f32 %v4459_v14, %v4458_v11  ;;  %v4461_v17 = vpop.f32.mrb[34].mxu1  ;;  %v4434_v18 = vpop.f32.mrb[35].mxu0 }
 0x189   : > { %v3004_v19 = vadd.f32 %v4432_v13, %v2956_v48  ;;  %v4435_v20 = vadd.f32 %v4434_v18, %v4433_v15  ;;  %v4462_v21 = vpop.f32.mrb[35].mxu1 }
 0x18a   : > { %v4463_v22 = vadd.f32 %v4462_v21, %v4461_v17 }
 0x18b   : > { %v3052_v23 = vadd.f32 %v4460_v16, %v3004_v19  ;;  %v3007_v24 = vadd.f32 %v4435_v20, %v2959_v50 }
 0x18d   : > { %v3055_v25 = vadd.f32 %v4463_v22, %v3007_v24  ;;  %v4436_v26 = vpop.f32.mrb[36].mxu0 }
 0x18e   : > { %v4437_v27 = vpop.f32.mrb[37].mxu0  ;;  %v4464_v30 = vpop.f32.mrb[36].mxu1 }
 0x18f   : > { %v4438_v28 = vadd.f32 %v4437_v27, %v4436_v26  ;;  %v4439_v29 = vpop.f32.mrb[38].mxu0  ;;  %v4465_v33 = vpop.f32.mrb[37].mxu1 }
 0x190   : > { %v4440_v31 = vpop.f32.mrb[39].mxu0  ;;  %v4466_v34 = vadd.f32 %v4465_v33, %v4464_v30  ;;  %v4467_v35 = vpop.f32.mrb[38].mxu1 }
 0x191   : > { %v3012_v32 = vadd.f32 %v4438_v28, %v2964_v2  ;;  %v4468_v36 = vpop.f32.mrb[39].mxu1 }
 0x193   : > { %v3060_v37 = vadd.f32 %v4466_v34, %v3012_v32  ;;  %v3357_v34 = vld [vmem:[%s5673_s3 + $0x20] sm:$0xff] }
 0x1a5   : > { %v4486_v39 = vpop.f32.mrb[40].mxu0 }
 0x1a6   : > { %v4514_v40 = vpop.f32.mrb[40].mxu1  ;;  %v4487_v41 = vpop.f32.mrb[41].mxu0 }
 0x1a7   : > { %v4488_v42 = vadd.f32 %v4487_v41, %v4486_v39  ;;  %v4515_v43 = vpop.f32.mrb[41].mxu1  ;;  %v4489_v44 = vpop.f32.mrb[42].mxu0  ;;  %v3365_v39 = vld [vmem:[%s5673_s3 + $0x60] sm:$0xff]  ;;  %v3367_v41 = vld [vmem:[%s5673_s3 + $0x70] sm:$0xff] }
 0x1a8   : > { %v4516_v45 = vadd.f32 %v4515_v43, %v4514_v40  ;;  %v4517_v46 = vpop.f32.mrb[42].mxu1  ;;  %v4490_v47 = vpop.f32.mrb[43].mxu0  ;;  %v3359_v40 = vld [vmem:[%s5673_s3 + $0x30] sm:$0xff] }
 0x1a9   : > { %v3100_v38 = vadd.f32 %v4488_v42, %v3052_v23  ;;  %v4491_v48 = vadd.f32 %v4490_v47, %v4489_v44  ;;  %v4518_v49 = vpop.f32.mrb[43].mxu1 }
 0x1aa   : > { %v4519_v50 = vadd.f32 %v4518_v49, %v4517_v46  ;;  %v3376_v49 = vld [vmem:[%s5673_s3 + $0xb8] sm:$0xff] }
 0x1ab   : > { %v3148_v52 = vadd.f32 %v4516_v45, %v3100_v38  ;;  %v3103_v53 = vadd.f32 %v4491_v48, %v3055_v25  ;;  %v3374_v45 = vld [vmem:[%s5673_s3 + $0xa8] sm:$0xff] }
 0x1ac   : > { %v3382_v48 = vld [vmem:[%s5673_s3 + $0xe8] sm:$0xff] }
 0x1ad   : > { %v3151_v51 = vadd.f32 %v4519_v50, %v3103_v53  ;;  %v4492_v54 = vpop.f32.mrb[44].mxu0  ;;  %v3384_v50 = vld [vmem:[%s5673_s3 + $0xf8] sm:$0xff]  ;;  %v4656_v53 = vpack.c.bf16 %v3365_v39, %v3357_v34 }
 0x1ae   : > { %v4493_v55 = vpop.f32.mrb[45].mxu0  ;;  %v4520_v58 = vpop.f32.mrb[44].mxu1 }
 0x1af   : > { %v4494_v56 = vadd.f32 %v4493_v55, %v4492_v54  ;;  %v4495_v57 = vpop.f32.mrb[46].mxu0  ;;  %v4521_v63 = vpop.f32.mrb[45].mxu1  ;;  %v3373_v54 = vld [vmem:[%s5673_s3 + $0xa0] sm:$0xff] }
 0x1b0   : > { %v4496_v59 = vpop.f32.mrb[47].mxu0  ;;  %v4522_v60 = vadd.f32 %v4521_v63, %v4520_v58  ;;  %v4523_v62 = vpop.f32.mrb[46].mxu1  ;;  %v3381_v57 = vld [vmem:[%s5673_s3 + $0xe0] sm:$0xff]  ;;  %v3375_v58 = vld [vmem:[%s5673_s3 + $0xb0] sm:$0xff]  ;;  %v4666_v63 = vpack.c.bf16 %v3384_v50, %v3376_v49 }
 0x1b1   : > { %v3108_v61 = vadd.f32 %v4494_v56, %v3060_v37  ;;  %v4524_v0 = vpop.f32.mrb[47].mxu1  ;;  %v3383_v59 = vld [vmem:[%s5673_s3 + $0xf0] sm:$0xff] }
 0x1b3   : > { %v3156_v1 = vadd.f32 %v4522_v60, %v3108_v61  ;;  %v4658_v61 = vpack.c.bf16 %v3382_v48, %v3374_v45 }
 0x1c5   : > { %v4542_v2 = vpop.f32.mrb[48].mxu0 }
 0x1c6   : > { %v4570_v3 = vpop.f32.mrb[48].mxu1  ;;  %v4543_v4 = vpop.f32.mrb[49].mxu0 }
 0x1c7   : > { %v4544_v5 = vadd.f32 %v4543_v4, %v4542_v2  ;;  %v4571_v7 = vpop.f32.mrb[49].mxu1  ;;  %v4545_v8 = vpop.f32.mrb[50].mxu0  ;;  %v4660_v2 = vpack.c.bf16 %v3381_v57, %v3373_v54 }
 0x1c8   : > { %v4572_v9 = vadd.f32 %v4571_v7, %v4570_v3  ;;  %v4573_v10 = vpop.f32.mrb[50].mxu1  ;;  %v4546_v11 = vpop.f32.mrb[51].mxu0  ;;  %v4668_v3 = vpack.c.bf16 %v3383_v59, %v3375_v58 }
 0x1c9   : > { %v3196_v12 = vadd.f32 %v4544_v5, %v3148_v52  ;;  %v4547_v13 = vadd.f32 %v4546_v11, %v4545_v8  ;;  %v4574_v14 = vpop.f32.mrb[51].mxu1 }
 0x1ca   : > { %v4575_v15 = vadd.f32 %v4574_v14, %v4573_v10  ;;  %v3392_v14 = vld [vmem:[%s5673_s3 + $0x138] sm:$0xf] }
 0x1cb   : > { %v3244_v16 = vadd.f32 %v4572_v9, %v3196_v12  ;;  %v3199_v17 = vadd.f32 %v4547_v13, %v3151_v51  ;;  %v4664_v51 = vpack.c.bf16 %v3367_v41, %v3359_v40  ;;  %v3390_v13 = vld [vmem:[%s5673_s3 + $0x128] sm:$0xf] }
 0x1cd   : > { %v3247_v18 = vadd.f32 %v4575_v15, %v3199_v17  ;;  %v4548_v19 = vpop.f32.mrb[52].mxu0  ;;  %v3391_v17 = vld [vmem:[%s5673_s3 + $0x130] sm:$0xf] }
 0x1ce   : > { %v4549_v20 = vpop.f32.mrb[53].mxu0  ;;  %v4576_v23 = vpop.f32.mrb[52].mxu1 }
 0x1cf   : > { %v4550_v21 = vadd.f32 %v4549_v20, %v4548_v19  ;;  %v4551_v22 = vpop.f32.mrb[54].mxu0  ;;  %v4577_v26 = vpop.f32.mrb[53].mxu1 }
 0x1d0   : > { %v4552_v24 = vpop.f32.mrb[55].mxu0  ;;  %v4578_v27 = vadd.f32 %v4577_v26, %v4576_v23  ;;  %v4579_v28 = vpop.f32.mrb[54].mxu1 }
 0x1d1   : > { %v3204_v25 = vadd.f32 %v4550_v21, %v3156_v1  ;;  %v4580_v29 = vpop.f32.mrb[55].mxu1 }
 0x1d3   : > { %v3252_v30 = vadd.f32 %v4578_v27, %v3204_v25 }
 0x1e5   : > { %v4598_v31 = vpop.f32.mrb[56].mxu0 }
 0x1e6   : > { %v4626_v32 = vpop.f32.mrb[56].mxu1  ;;  %v4599_v33 = vpop.f32.mrb[57].mxu0 }
 0x1e7   : > { %v4600_v35 = vadd.f32 %v4599_v33, %v4598_v31  ;;  %v4627_v36 = vpop.f32.mrb[57].mxu1  ;;  %v4601_v37 = vpop.f32.mrb[58].mxu0 }
 0x1e8   : > { %v4628_v42 = vadd.f32 %v4627_v36, %v4626_v32  ;;  %v4629_v43 = vpop.f32.mrb[58].mxu1  ;;  %v4602_v44 = vpop.f32.mrb[59].mxu0 }
 0x1e9   : > { %v3292_v46 = vadd.f32 %v4600_v35, %v3244_v16  ;;  %v4603_v47 = vadd.f32 %v4602_v44, %v4601_v37  ;;  %v4630_v38 = vpop.f32.mrb[59].mxu1  ;;  %v3389_v16 = vld [vmem:[%s5673_s3 + $0x120] sm:$0xf] }
 0x1ea   : > { %v4631_v52 = vadd.f32 %v4630_v38, %v4629_v43 }
 0x1eb   : > { %v3340_v55 = vadd.f32 %v4628_v42, %v3292_v46  ;;  %v3295_v56 = vadd.f32 %v4603_v47, %v3247_v18 }
 0x1ed   : > { %v3343_v60 = vadd.f32 %v4631_v52, %v3295_v56  ;;  %v4604_v62 = vpop.f32.mrb[60].mxu0  ;;  %4169 = vmatmul.mubr.msk.f32.vlgmr.msra.gmra.mrb[64].mxu0 %vm3393_vm1, %v3340_v55  ;;  %4174 = vmatmul.mubr.msk.f32.vlgmr.msra.gmra.mrb[64].mxu1 %vm3393_vm1, %v3340_v55 }
 0x1ee   : > { %v4632_v0 = vpop.f32.mrb[60].mxu1  ;;  %4657 = vmatpush1.bf16.msra.mxu0 %v4656_v53  ;;  %4665 = vmatpush1.bf16.msra.mxu1 %v4664_v51  ;;  %v4605_v1 = vpop.f32.mrb[61].mxu0 }
 0x1ef   : > { %v4606_v4 = vadd.f32 %v4605_v1, %v4604_v62  ;;  %v4633_v5 = vpop.f32.mrb[61].mxu1  ;;  %v4607_v7 = vpop.f32.mrb[62].mxu0  ;;  %3498 = vmatprep.mubr.f32.mxu0 %v4980_v6  ;;  %3581 = vmatprep.mubr.f32.mxu1 %v4980_v6 }
 0x1f0   : > { %v4634_v8 = vadd.f32 %v4633_v5, %v4632_v0  ;;  %v4635_v9 = vpop.f32.mrb[62].mxu1  ;;  %v4608_v10 = vpop.f32.mrb[63].mxu0  ;;  %4659 = vmatprep.subr.bf16.mxu0 %v4658_v61  ;;  %4667 = vmatprep.subr.bf16.mxu1 %v4666_v63 }
 0x1f1   : > { %v3300_v11 = vadd.f32 %v4606_v4, %v3252_v30  ;;  %v4636_v12 = vpop.f32.mrb[63].mxu1  ;;  %4170 = vmatmul.mubr.msk.f32.gmra.mrb[66].mxu0 %vm3393_vm1, %v3343_v60  ;;  %4175 = vmatmul.mubr.msk.f32.gmra.mrb[66].mxu1 %vm3393_vm1, %v3343_v60 }
 0x1f2   : > { %4661 = vmatpush1.bf16.msra.mxu0 %v4660_v2  ;;  %4669 = vmatpush1.bf16.msra.mxu1 %v4668_v3 }
 0x1f3   : > { %v3348_v15 = vadd.f32 %v4634_v8, %v3300_v11  ;;  %3504 = vmatprep.mubr.f32.mxu0 %v4980_v6  ;;  %3587 = vmatprep.mubr.f32.mxu1 %v4980_v6 }
 0x1f4   : > { %4177 = vmatprep.subr.msk.mxu0 %vm3403_vm0, %v3390_v13  ;;  %4182 = vmatprep.subr.msk.mxu1 %vm3403_vm0, %v3392_v14 }
 0x1f5   : > { %4171 = vmatmul.mubr.msk.f32.gmra.mrb[68].mxu0 %vm3393_vm1, %v3348_v15  ;;  %4176 = vmatmul.mubr.msk.f32.gmra.mrb[68].mxu1 %vm3393_vm1, %v3348_v15 }
 0x1f6   : > { %4178 = vmatpush1.msk.msra.mxu0 %vm3403_vm0, %v3389_v16  ;;  %4183 = vmatpush1.msk.msra.mxu1 %vm3403_vm0, %v3391_v17 }
 0x1f7   : > { %3658 = vmatprep.mubr.f32.mxu0 %v4980_v6  ;;  %3741 = vmatprep.mubr.f32.mxu1 %v4980_v6 }
 0x1f9   : > { %4179 = vmatmul.mubr.msk.f32.vlgmr.msra.gmra.mrb[70].mxu0 %vm3393_vm1, %v3340_v55  ;;  %4184 = vmatmul.mubr.msk.f32.vlgmr.msra.gmra.mrb[70].mxu1 %vm3393_vm1, %v3340_v55 }
 0x1fa   : > { %3664 = vmatprep.mubr.f32.mxu0 %v4980_v6  ;;  %3747 = vmatprep.mubr.f32.mxu1 %v4980_v6 }
 0x1fd   : > { %4180 = vmatmul.mubr.msk.f32.gmra.mrb[72].mxu0 %vm3393_vm1, %v3343_v60  ;;  %4185 = vmatmul.mubr.msk.f32.gmra.mrb[72].mxu1 %vm3393_vm1, %v3343_v60 }
 0x1fe   : > { %3670 = vmatprep.mubr.f32.mxu0 %v4980_v6  ;;  %3753 = vmatprep.mubr.f32.mxu1 %v4980_v6 }
 0x201   : > { %4181 = vmatmul.mubr.msk.f32.gmra.mrb[74].mxu0 %vm3393_vm1, %v3348_v15  ;;  %4186 = vmatmul.mubr.msk.f32.gmra.mrb[74].mxu1 %vm3393_vm1, %v3348_v15 }
 0x2c0   : > { %v3494_v18 = vpop.f32.mrb[64].mxu0  ;;  %v3577_v6 = vpop.f32.mrb[64].mxu1 }
 0x2c1   : > { %3760 = vst [vmem:[%s5641_s17] sm:$0xff] %v3494_v18  ;;  %3762 = vst [vmem:[%s5641_s17 + $0x10] sm:$0xff] %v3577_v6  ;;  %v3496_v19 = vpop.f32.mrb[65].mxu0  ;;  %v3579_v20 = vpop.f32.mrb[65].mxu1 }
 0x2c2   : > { %3761 = vst [vmem:[%s5641_s17 + $0x8] sm:$0xff] %v3496_v19  ;;  %3763 = vst [vmem:[%s5641_s17 + $0x18] sm:$0xff] %v3579_v20 }
 0x2c4   : > { %v3500_v21 = vpop.f32.mrb[66].mxu0  ;;  %v3583_v22 = vpop.f32.mrb[66].mxu1 }
 0x2c5   : > { %3768 = vst [vmem:[%s5641_s17 + $0x40] sm:$0xff] %v3500_v21  ;;  %3770 = vst [vmem:[%s5641_s17 + $0x50] sm:$0xff] %v3583_v22  ;;  %v3502_v23 = vpop.f32.mrb[67].mxu0  ;;  %v3585_v24 = vpop.f32.mrb[67].mxu1 }
 0x2c6   : > { %3769 = vst [vmem:[%s5641_s17 + $0x48] sm:$0xff] %v3502_v23  ;;  %3771 = vst [vmem:[%s5641_s17 + $0x58] sm:$0xff] %v3585_v24 }
 0x2c8   : > { %v3506_v25 = vpop.f32.mrb[68].mxu0  ;;  %v3589_v26 = vpop.f32.mrb[68].mxu1 }
 0x2c9   : > { %3776 = vst [vmem:[%s5641_s17 + $0x80] sm:$0x1f] %v3506_v25  ;;  %3778 = vst [vmem:[%s5641_s17 + $0x90] sm:$0x1f] %v3589_v26  ;;  %v3508_v27 = vpop.f32.mrb[69].mxu0  ;;  %v3591_v28 = vpop.f32.mrb[69].mxu1 }
 0x2ca   : > { %3777 = vst [vmem:[%s5641_s17 + $0x88] sm:$0x1f] %v3508_v27  ;;  %3779 = vst [vmem:[%s5641_s17 + $0x98] sm:$0x1f] %v3591_v28 }
 0x2cc   : > { %v3660_v29 = vpop.f32.mrb[70].mxu0  ;;  %v3743_v30 = vpop.f32.mrb[70].mxu1 }
 0x2cd   : > { %3764 = vst [vmem:[%s5641_s17 + $0x20] sm:$0xff] %v3660_v29  ;;  %3766 = vst [vmem:[%s5641_s17 + $0x30] sm:$0xff] %v3743_v30  ;;  %v3662_v31 = vpop.f32.mrb[71].mxu0  ;;  %v3745_v32 = vpop.f32.mrb[71].mxu1 }
 0x2ce   : > { %3765 = vst [vmem:[%s5641_s17 + $0x28] sm:$0xff] %v3662_v31  ;;  %3767 = vst [vmem:[%s5641_s17 + $0x38] sm:$0xff] %v3745_v32 }
 0x2d0   : > { %v3666_v33 = vpop.f32.mrb[72].mxu0  ;;  %v3749_v34 = vpop.f32.mrb[72].mxu1 }
 0x2d1   : > { %3772 = vst [vmem:[%s5641_s17 + $0x60] sm:$0xff] %v3666_v33  ;;  %3774 = vst [vmem:[%s5641_s17 + $0x70] sm:$0xff] %v3749_v34  ;;  %v3668_v35 = vpop.f32.mrb[73].mxu0  ;;  %v3751_v36 = vpop.f32.mrb[73].mxu1 }
 0x2d2   : > { %3773 = vst [vmem:[%s5641_s17 + $0x68] sm:$0xff] %v3668_v35  ;;  %3775 = vst [vmem:[%s5641_s17 + $0x78] sm:$0xff] %v3751_v36 }
 0x2d4   : > { %v3672_v37 = vpop.f32.mrb[74].mxu0  ;;  %v3755_v39 = vpop.f32.mrb[74].mxu1 }
 0x2d5   : > { %3780 = vst [vmem:[%s5641_s17 + $0xa0] sm:$0x1f] %v3672_v37  ;;  %3782 = vst [vmem:[%s5641_s17 + $0xb0] sm:$0x1f] %v3755_v39  ;;  %v3674_v40 = vpop.f32.mrb[75].mxu0  ;;  %v3757_v41 = vpop.f32.mrb[75].mxu1 }
 0x2d6   : > { %3781 = vst [vmem:[%s5641_s17 + $0xa8] sm:$0x1f] %v3674_v40  ;;  %3783 = vst [vmem:[%s5641_s17 + $0xb8] sm:$0x1f] %v3757_v41 }
 0x2d7 PF: > { %s14_s15 = sadd.s32 1, %s4977_s15  }
 0x2d8   : > { %p11_p4 = scmp.ge.s32.totalorder %s14_s15, 4  }
 0x2da   :  { %13 = sbr.rel (!%p11_p4) target bundleno = 1 (0x1), region = 66 }

</bundles_post_ra>
